<compile_context>
chip_gen: v5e
topology: v5e:2x2
jax: 0.10.0
libtpu: 0.0.40
codegen_flags: <defaults>
</compile_context>

<pallas_src>
import numpy as np
import jax
import jax.numpy as jnp
from jax import lax
from jax.experimental import pallas as pl
from jax.experimental.pallas import tpu as pltpu

LN_EPS = 1e-5
OUT_LANES = 128                       # lane-aligned packed scalar output
VMEM_LIMIT_BYTES = 48 * 1024 * 1024   # explicit scoped-VMEM cap (headroom on v7x)
GRAPH_TILE_VMEM_BUDGET = 16 * 1024 * 1024  # cap for the double-buffered graph tile


def _round_up(x, m):
    return ((x + m - 1) // m) * m


def make_ccanet_kernel(hidden_dim: int, lam: float, tile_rows: int, n_rows: int):
    H = int(hidden_dim)
    lam = float(lam)
    tile_rows = int(tile_rows)
    n_rows = int(n_rows)
    need_row_mask = (n_rows % tile_rows) != 0   # static: compiled out when divisible

    def kernel(graph_ref, motif_ref, wg_ref, bg_ref, wm_ref, bm_ref,
               lnw_ref, lnb_ref, wpg_ref, wpm_ref, bp_ref, wot_ref, bo_ref,
               out_ref, g_acc):
        pid = pl.program_id(0)
        Hf = jnp.float32(H)
        lnw = lnw_ref[...]            # (1, H)
        lnb = lnb_ref[...]            # (1, H)

        def layernorm(x):
            # One-pass stats: the two lane reductions are independent, which
            # shortens the XLU dependency chain vs. mean->center->square->mean.
            s = jnp.sum(x, axis=-1, keepdims=True)
            s2 = jnp.sum(x * x, axis=-1, keepdims=True)
            mu = s / Hf
            var = jnp.maximum(s2 / Hf - mu * mu, 0.0)
            return (x - mu) * lax.rsqrt(var + LN_EPS) * lnw + lnb

        @pl.when(pid == 0)
        def _init():
            g_acc[...] = jnp.zeros_like(g_acc)

        # ---- O(n_graph) branch: per-tile Linear + LayerNorm + row-sum ----
        gh = jnp.dot(graph_ref[...], wg_ref[...],
                     preferred_element_type=jnp.float32) + bg_ref[...]
        graph_cca = layernorm(gh)                               # (TM, H) f32
        if need_row_mask:
            row = pid * tile_rows + lax.broadcasted_iota(
                jnp.int32, (tile_rows, 1), 0)
            graph_cca = jnp.where(row < n_rows, graph_cca, 0.0)  # mask tail rows
        g_acc[...] += jnp.sum(graph_cca, axis=0, keepdims=True)   # (1, H)

        # ---- epilogue: runs once, on the last row tile ----
        @pl.when(pid == pl.num_programs(0) - 1)
        def _finalize():
            g = g_acc[...]                                       # (1, H)
            mh = jnp.dot(motif_ref[...], wm_ref[...],
                         preferred_element_type=jnp.float32) + bm_ref[...]
            m = layernorm(mh)                                    # (1, H)

            # c = g^T m, c1 = g^T g, c2 = m^T m are rank-1 outer products, so the
            # CCA losses have exact closed forms (identical to materializing the
            # HxH matrices + torch.eye):
            #   -diag(c).mean()        = -sum(g*m)/H
            #   mean((I - g^T g)^2)    = (H - 2*sum(g^2) + sum(g^2)^2) / H^2
            loss_inv = -jnp.sum(g * m, axis=1, keepdims=True) / Hf   # (1,1)
            s1 = jnp.sum(g * g, axis=1, keepdims=True)
            s2 = jnp.sum(m * m, axis=1, keepdims=True)
            loss_dec1 = (Hf - 2.0 * s1 + s1 * s1) / (Hf * Hf)
            loss_dec2 = (Hf - 2.0 * s2 + s2 * s2) / (Hf * Hf)
            reg = loss_inv + lam * (loss_dec1 + loss_dec2)           # (1,1)

            # pred_layer1(cat([g, m], dim=1)) == g @ Wp[:H] + m @ Wp[H:] + bp
            y = (jnp.dot(g, wpg_ref[...], preferred_element_type=jnp.float32)
                 + jnp.dot(m, wpm_ref[...], preferred_element_type=jnp.float32)
                 + bp_ref[...])
            y = jnp.maximum(y, 0.0)                                  # ReLU
            # output Linear(H, 1): VPU multiply + lane reduce (no 1-wide MXU matmul).
            mean = jnp.maximum(
                jnp.sum(y * wot_ref[...], axis=1, keepdims=True) + bo_ref[...],
                0.0)                                                 # (1,1) F.relu

            # Single lane-aligned output: lane 0 = mean, lane 1 = cca_reg.
            lane = lax.broadcasted_iota(jnp.int32, (1, OUT_LANES), 1)
            out_ref[...] = jnp.where(lane == 0, mean,
                                     jnp.where(lane == 1, reg, 0.0))

    return kernel


def ccanet_forward(graph, motif, params, *, hidden_dim, lam, tm=512,
                   bf16_matmul=False):
    n_graph, graph_dim = graph.shape
    assert motif.shape[0] == 1, (
        "torch.mm shape constraints in the reference forward imply a single "
        "motif row")
    H = int(hidden_dim)

    # Pre-split pred_layer1 weight (no in-kernel slicing across sublane tiles)
    # and pre-transpose the output weight for the VPU mul + lane reduce.
    wp_g = params["wp"][:H, :]
    wp_m = params["wp"][H:, :]
    wo_t = params["wo"].reshape(1, H)

    graph_in = graph
    wg = params["wg"]
    if bf16_matmul:
        # Halves HBM traffic of the only O(Ng) input; f32 accumulation on the MXU.
        graph_in = graph_in.astype(jnp.bfloat16)
        wg = wg.astype(jnp.bfloat16)

    # Row-tile size: multiple of 8 sublanes, large enough to amortize per-step
    # overhead, capped so the double-buffered graph tile fits in scoped VMEM
    # (v7x has only 64 MiB physical VMEM per TensorCore).
    bytes_per_row = graph_dim * graph_in.dtype.itemsize
    max_tm = max(8, (GRAPH_TILE_VMEM_BUDGET // (2 * bytes_per_row)) // 8 * 8)
    tm = int(min(_round_up(int(tm), 8), max_tm, _round_up(n_graph, 8)))
    grid = (pl.cdiv(n_graph, tm),)

    args = (graph_in, motif, wg, params["bg"], params["wm"], params["bm"],
            params["ln_w"], params["ln_b"], wp_g, wp_m, params["bp"],
            wo_t, params["bo"])

    # Graph is tiled over rows; every other operand is a full-array block whose
    # block index never changes, so it is DMA'd into VMEM once (no re-fetch).
    def const_spec(a):
        return pl.BlockSpec(a.shape, lambda i: (0, 0))

    in_specs = [pl.BlockSpec((tm, graph_dim), lambda i: (i, 0))]
    in_specs += [const_spec(a) for a in args[1:]]

    out = pl.pallas_call(
        make_ccanet_kernel(H, lam, tm, n_graph),
        out_shape=jax.ShapeDtypeStruct((1, OUT_LANES), jnp.float32),
        grid_spec=pltpu.PrefetchScalarGridSpec(
            num_scalar_prefetch=0,
            grid=grid,
            in_specs=in_specs,
            out_specs=pl.BlockSpec((1, OUT_LANES), lambda i: (0, 0)),
            scratch_shapes=[pltpu.VMEM((1, H), jnp.float32)],
        ),
        compiler_params=pltpu.CompilerParams(
            dimension_semantics=("arbitrary",),   # row-tile axis is a reduction
            vmem_limit_bytes=VMEM_LIMIT_BYTES,
        ),
    )(*args)

    mean = out[:1, :1]        # (1, 1)
    reg = out[0, 1]           # scalar
    return mean, reg


def init_params(key, pattern_dim, graph_dim, hidden_dim):
    """Deterministic init mirroring CCANet.reset_parameter (weights stored (in, out))."""
    H = hidden_dim
    ks = jax.random.split(key, 4)

    def xavier_uniform(k, fan_in, fan_out):
        b = np.sqrt(6.0 / (fan_in + fan_out))
        return jax.random.uniform(k, (fan_in, fan_out), jnp.float32, -b, b)

    def kaiming_uniform_relu(k, fan_in, fan_out):
        b = np.sqrt(6.0 / fan_in)   # gain=sqrt(2), bound = gain*sqrt(3/fan_in)
        return jax.random.uniform(k, (fan_in, fan_out), jnp.float32, -b, b)

    return {
        "wg": xavier_uniform(ks[0], graph_dim, H),
        "bg": jnp.zeros((1, H), jnp.float32),
        "wm": xavier_uniform(ks[1], pattern_dim, H),
        "bm": jnp.zeros((1, H), jnp.float32),
        "ln_w": jnp.ones((1, H), jnp.float32),
        "ln_b": jnp.zeros((1, H), jnp.float32),
        "wp": xavier_uniform(ks[2], 2 * H, H),
        "bp": jnp.zeros((1, H), jnp.float32),
        "wo": kaiming_uniform_relu(ks[3], H, 1),
        "bo": jnp.zeros((1, 1), jnp.float32),
    }


def reference_forward(graph, motif, params, lam):
    """Pure-JAX mirror of the PyTorch forward (explicitly forms c, c1, c2, eye)."""
    def ln(x):
        mu = jnp.mean(x, axis=-1, keepdims=True)
        var = jnp.mean((x - mu) ** 2, axis=-1, keepdims=True)
        return (x - mu) / jnp.sqrt(var + LN_EPS) * params["ln_w"] + params["ln_b"]

    g = ln(graph @ params["wg"] + params["bg"])
    m = ln(motif @ params["wm"] + params["bm"])
    g = jnp.sum(g, axis=0).reshape(1, -1)
    c = g.T @ m
    c1 = g.T @ g
    c2 = m.T @ m
    loss_inv = -jnp.mean(jnp.diagonal(c))
    iden = jnp.eye(c.shape[0], dtype=jnp.float32)
    loss_dec1 = jnp.mean((iden - c1) ** 2)
    loss_dec2 = jnp.mean((iden - c2) ** 2)
    y = jnp.concatenate([g, m], axis=1) @ params["wp"] + params["bp"]
    y = jnp.maximum(y, 0.0)
    mean = jnp.maximum(y @ params["wo"] + params["bo"], 0.0)
    reg = loss_inv + lam * (loss_dec1 + loss_dec2)
    return mean, reg


if __name__ == "__main__":
    # Small shapes consistent with the module's forward.  hidden_dim is chosen
    # as a multiple of 128 so all H-axis work is lane-dense (per perf review);
    # n_graph is NOT a multiple of the row tile so the tail-mask path is tested.
    pattern_dim, graph_dim, hidden_dim = 16, 32, 128
    lam = 0.1
    n_graph = 500
    n_motif = 1          # torch.mm shape constraints imply a single motif row

    key = jax.random.PRNGKey(0)
    kp, kg, km = jax.random.split(key, 3)
    params = init_params(kp, pattern_dim, graph_dim, hidden_dim)
    graph = jax.random.normal(kg, (n_graph, graph_dim), jnp.float32)
    motif = jax.random.normal(km, (n_motif, pattern_dim), jnp.float32)

    mean, reg = ccanet_forward(graph, motif, params,
                               hidden_dim=hidden_dim, lam=lam, tm=128)
    jax.block_until_ready((mean, reg))

    ref_mean, ref_reg = reference_forward(graph, motif, params, lam)
    np.testing.assert_allclose(np.asarray(mean), np.asarray(ref_mean),
                               rtol=2e-3, atol=2e-3)
    np.testing.assert_allclose(np.asarray(reg).reshape(()), np.asarray(ref_reg),
                               rtol=2e-3, atol=2e-3)
    # NOTE: nn.Dropout is defined in __init__ but never applied in forward().
    print("KERNEL_OK")
</pallas_src>

<mosaic_0001>
module attributes {stable_mosaic.version = 11 : i64} {
  func.func @kernel(%arg0: i32, %arg1: memref<128x32xf32, #tpu.memory_space<vmem>>, %arg2: memref<1x16xf32, #tpu.memory_space<vmem>>, %arg3: memref<32x128xf32, #tpu.memory_space<vmem>>, %arg4: memref<1x128xf32, #tpu.memory_space<vmem>>, %arg5: memref<16x128xf32, #tpu.memory_space<vmem>>, %arg6: memref<1x128xf32, #tpu.memory_space<vmem>>, %arg7: memref<1x128xf32, #tpu.memory_space<vmem>>, %arg8: memref<1x128xf32, #tpu.memory_space<vmem>>, %arg9: memref<128x128xf32, #tpu.memory_space<vmem>>, %arg10: memref<128x128xf32, #tpu.memory_space<vmem>>, %arg11: memref<1x128xf32, #tpu.memory_space<vmem>>, %arg12: memref<1x128xf32, #tpu.memory_space<vmem>>, %arg13: memref<1x1xf32, #tpu.memory_space<vmem>>, %arg14: memref<1x128xf32, #tpu.memory_space<vmem>>, %arg15: memref<1x128xf32, #tpu.memory_space<vmem>>) attributes {dimension_semantics = [#tpu.dimension_semantics<arbitrary>], iteration_bounds = array<i64: 4>, scalar_prefetch = 0 : i64, scratch_operands = 1 : i64, tpu.core_type = #tpu.core_type<tc>, window_params = [{transform_indices = @transform_0, window_bounds = array<i64: 128, 32>}, {pipeline_mode = #tpu.pipeline_mode<synchronous>, transform_indices = @transform_1, window_bounds = array<i64: 1, 16>}, {pipeline_mode = #tpu.pipeline_mode<synchronous>, transform_indices = @transform_2, window_bounds = array<i64: 32, 128>}, {pipeline_mode = #tpu.pipeline_mode<synchronous>, transform_indices = @transform_3, window_bounds = array<i64: 1, 128>}, {pipeline_mode = #tpu.pipeline_mode<synchronous>, transform_indices = @transform_4, window_bounds = array<i64: 16, 128>}, {pipeline_mode = #tpu.pipeline_mode<synchronous>, transform_indices = @transform_5, window_bounds = array<i64: 1, 128>}, {pipeline_mode = #tpu.pipeline_mode<synchronous>, transform_indices = @transform_6, window_bounds = array<i64: 1, 128>}, {pipeline_mode = #tpu.pipeline_mode<synchronous>, transform_indices = @transform_7, window_bounds = array<i64: 1, 128>}, {pipeline_mode = #tpu.pipeline_mode<synchronous>, transform_indices = @transform_8, window_bounds = array<i64: 128, 128>}, {pipeline_mode = #tpu.pipeline_mode<synchronous>, transform_indices = @transform_9, window_bounds = array<i64: 128, 128>}, {pipeline_mode = #tpu.pipeline_mode<synchronous>, transform_indices = @transform_10, window_bounds = array<i64: 1, 128>}, {pipeline_mode = #tpu.pipeline_mode<synchronous>, transform_indices = @transform_11, window_bounds = array<i64: 1, 128>}, {pipeline_mode = #tpu.pipeline_mode<synchronous>, transform_indices = @transform_12, window_bounds = array<i64: 1, 1>}, {pipeline_mode = #tpu.pipeline_mode<synchronous>, transform_indices = @transform_13, window_bounds = array<i64: 1, 128>}]} {
    %c0 = arith.constant 0 : index
    %c0_0 = arith.constant 0 : index
    %0 = vector.load %arg7[%c0, %c0_0] : memref<1x128xf32, #tpu.memory_space<vmem>>, vector<1x128xf32>
    %c0_1 = arith.constant 0 : index
    %c0_2 = arith.constant 0 : index
    %1 = vector.load %arg8[%c0_1, %c0_2] : memref<1x128xf32, #tpu.memory_space<vmem>>, vector<1x128xf32>
    %c0_i32 = arith.constant 0 : i32
    %2 = arith.cmpi eq, %arg0, %c0_i32 : i32
    %3 = arith.extui %2 : i1 to i32
    %c0_i32_3 = arith.constant 0 : i32
    %4 = arith.cmpi ne, %3, %c0_i32_3 : i32
    scf.if %4 {
      %cst_24 = arith.constant 0.000000e+00 : f32
      %53 = vector.broadcast %cst_24 : f32 to vector<1x128xf32>
      %c0_25 = arith.constant 0 : index
      %c0_26 = arith.constant 0 : index
      %54 = vector.load %arg15[%c0_25, %c0_26] : memref<1x128xf32, #tpu.memory_space<vmem>>, vector<1x128xf32>
      tpu.vector_store %arg15[%c0_25, %c0_26], %53 {strides = array<i32>} : memref<1x128xf32, #tpu.memory_space<vmem>>, vector<1x128xf32>,
    } else {
    }
    %c0_4 = arith.constant 0 : index
    %c0_5 = arith.constant 0 : index
    %5 = vector.load %arg1[%c0_4, %c0_5] : memref<128x32xf32, #tpu.memory_space<vmem>>, vector<128x32xf32>
    %c0_6 = arith.constant 0 : index
    %c0_7 = arith.constant 0 : index
    %6 = vector.load %arg3[%c0_6, %c0_7] : memref<32x128xf32, #tpu.memory_space<vmem>>, vector<32x128xf32>
    %cst = arith.constant dense<0.000000e+00> : vector<128x128xf32>
    %7 = tpu.matmul %5, %6, %cst {dimension_numbers = #tpu.dot_dimension_numbers<[1], [0], [0], [1], [0, 0, 1, 1], [], []>} : vector<128x32xf32>, vector<32x128xf32>, vector<128x128xf32> -> vector<128x128xf32>
    %c0_8 = arith.constant 0 : index
    %c0_9 = arith.constant 0 : index
    %8 = vector.load %arg4[%c0_8, %c0_9] : memref<1x128xf32, #tpu.memory_space<vmem>>, vector<1x128xf32>
    %9 = vector.broadcast %8 : vector<1x128xf32> to vector<128x128xf32>
    %10 = arith.addf %7, %9 : vector<128x128xf32>
    %cst_10 = arith.constant dense<0.000000e+00> : vector<128xf32>
    %11 = vector.multi_reduction <add>, %10, %cst_10 [1] : vector<128x128xf32> to vector<128xf32>
    %12 = vector.shape_cast %11 : vector<128xf32> to vector<128x1xf32>
    %13 = arith.mulf %10, %10 : vector<128x128xf32>
    %cst_11 = arith.constant dense<0.000000e+00> : vector<128xf32>
    %14 = vector.multi_reduction <add>, %13, %cst_11 [1] : vector<128x128xf32> to vector<128xf32>
    %15 = vector.shape_cast %14 : vector<128xf32> to vector<128x1xf32>
    %cst_12 = arith.constant 1.280000e+02 : f32
    %16 = vector.broadcast %cst_12 : f32 to vector<128x1xf32>
    %17 = arith.divf %12, %16 : vector<128x1xf32>
    %cst_13 = arith.constant 1.280000e+02 : f32
    %18 = vector.broadcast %cst_13 : f32 to vector<128x1xf32>
    %19 = arith.divf %15, %18 : vector<128x1xf32>
    %20 = arith.mulf %17, %17 : vector<128x1xf32>
    %21 = arith.subf %19, %20 : vector<128x1xf32>
    %cst_14 = arith.constant 0.000000e+00 : f32
    %22 = vector.broadcast %cst_14 : f32 to vector<128x1xf32>
    %23 = arith.maximumf %21, %22 : vector<128x1xf32>
    %24 = vector.broadcast %17 : vector<128x1xf32> to vector<128x128xf32>
    %25 = arith.subf %10, %24 : vector<128x128xf32>
    %cst_15 = arith.constant 9.99999974E-6 : f32
    %26 = vector.broadcast %cst_15 : f32 to vector<128x1xf32>
    %27 = arith.addf %23, %26 : vector<128x1xf32>
    %28 = math.rsqrt %27 : vector<128x1xf32>
    %29 = vector.broadcast %28 : vector<128x1xf32> to vector<128x128xf32>
    %30 = arith.mulf %25, %29 : vector<128x128xf32>
    %31 = vector.broadcast %0 : vector<1x128xf32> to vector<128x128xf32>
    %32 = arith.mulf %30, %31 : vector<128x128xf32>
    %33 = vector.broadcast %1 : vector<1x128xf32> to vector<128x128xf32>
    %34 = arith.addf %32, %33 : vector<128x128xf32>
    %c128_i32 = arith.constant 128 : i32
    %35 = arith.muli %arg0, %c128_i32 : i32
    %36 = tpu.iota {dimensions = array<i32: 0>} : vector<128x1xi32>
    %37 = vector.broadcast %35 : i32 to vector<128x1xi32>
    %38 = arith.addi %37, %36 : vector<128x1xi32>
    %c500_i32 = arith.constant 500 : i32
    %39 = vector.broadcast %c500_i32 : i32 to vector<128x1xi32>
    %40 = arith.cmpi slt, %38, %39 : vector<128x1xi32>
    %cst_16 = arith.constant 0.000000e+00 : f32
    %41 = vector.shape_cast %40 : vector<128x1xi1> to vector<128x1xi1>
    %42 = vector.broadcast %41 : vector<128x1xi1> to vector<128x128xi1>
    %43 = vector.broadcast %cst_16 : f32 to vector<128x128xf32>
    %44 = arith.select %42, %34, %43 : vector<128x128xi1>, vector<128x128xf32>
    %c0_17 = arith.constant 0 : index
    %c0_18 = arith.constant 0 : index
    %45 = vector.load %arg15[%c0_17, %c0_18] : memref<1x128xf32, #tpu.memory_space<vmem>>, vector<1x128xf32>
    %cst_19 = arith.constant dense<0.000000e+00> : vector<128xf32>
    %46 = vector.multi_reduction <add>, %44, %cst_19 [0] : vector<128x128xf32> to vector<128xf32>
    %47 = vector.shape_cast %46 : vector<128xf32> to vector<1x128xf32>
    %48 = arith.addf %45, %47 : vector<1x128xf32>
    %c0_20 = arith.constant 0 : index
    %c0_21 = arith.constant 0 : index
    %49 = vector.load %arg15[%c0_20, %c0_21] : memref<1x128xf32, #tpu.memory_space<vmem>>, vector<1x128xf32>
    tpu.vector_store %arg15[%c0_20, %c0_21], %48 {strides = array<i32>} : memref<1x128xf32, #tpu.memory_space<vmem>>, vector<1x128xf32>,
    %c3_i32 = arith.constant 3 : i32
    %50 = arith.cmpi eq, %arg0, %c3_i32 : i32
    %51 = arith.extui %50 : i1 to i32
    %cst_22 = arith.constant 1.280000e+02 : f32
    %c0_i32_23 = arith.constant 0 : i32
    %52 = arith.cmpi ne, %51, %c0_i32_23 : i32
    scf.if %52 {
      %c0_24 = arith.constant 0 : index
      %c0_25 = arith.constant 0 : index
      %53 = vector.load %arg15[%c0_24, %c0_25] : memref<1x128xf32, #tpu.memory_space<vmem>>, vector<1x128xf32>
      %c0_26 = arith.constant 0 : index
      %c0_27 = arith.constant 0 : index
      %54 = vector.load %arg2[%c0_26, %c0_27] : memref<1x16xf32, #tpu.memory_space<vmem>>, vector<1x16xf32>
      %c0_28 = arith.constant 0 : index
      %c0_29 = arith.constant 0 : index
      %55 = vector.load %arg5[%c0_28, %c0_29] : memref<16x128xf32, #tpu.memory_space<vmem>>, vector<16x128xf32>
      %cst_30 = arith.constant dense<0.000000e+00> : vector<1x128xf32>
      %56 = tpu.matmul %54, %55, %cst_30 {dimension_numbers = #tpu.dot_dimension_numbers<[1], [0], [0], [1], [0, 0, 1, 1], [], []>} : vector<1x16xf32>, vector<16x128xf32>, vector<1x128xf32> -> vector<1x128xf32>
      %c0_31 = arith.constant 0 : index
      %c0_32 = arith.constant 0 : index
      %57 = vector.load %arg6[%c0_31, %c0_32] : memref<1x128xf32, #tpu.memory_space<vmem>>, vector<1x128xf32>
      %58 = arith.addf %56, %57 : vector<1x128xf32>
      %cst_33 = arith.constant dense<0.000000e+00> : vector<1xf32>
      %59 = vector.multi_reduction <add>, %58, %cst_33 [1] : vector<1x128xf32> to vector<1xf32>
      %60 = vector.shape_cast %59 : vector<1xf32> to vector<1x1xf32>
      %61 = arith.mulf %58, %58 : vector<1x128xf32>
      %cst_34 = arith.constant dense<0.000000e+00> : vector<1xf32>
      %62 = vector.multi_reduction <add>, %61, %cst_34 [1] : vector<1x128xf32> to vector<1xf32>
      %63 = vector.shape_cast %62 : vector<1xf32> to vector<1x1xf32>
      %64 = vector.broadcast %cst_22 : f32 to vector<1x1xf32>
      %65 = arith.divf %60, %64 : vector<1x1xf32>
      %66 = vector.broadcast %cst_22 : f32 to vector<1x1xf32>
      %67 = arith.divf %63, %66 : vector<1x1xf32>
      %68 = arith.mulf %65, %65 : vector<1x1xf32>
      %69 = arith.subf %67, %68 : vector<1x1xf32>
      %cst_35 = arith.constant 0.000000e+00 : f32
      %70 = vector.broadcast %cst_35 : f32 to vector<1x1xf32>
      %71 = arith.maximumf %69, %70 : vector<1x1xf32>
      %72 = vector.broadcast %65 : vector<1x1xf32> to vector<1x128xf32>
      %73 = arith.subf %58, %72 : vector<1x128xf32>
      %cst_36 = arith.constant 9.99999974E-6 : f32
      %74 = vector.broadcast %cst_36 : f32 to vector<1x1xf32>
      %75 = arith.addf %71, %74 : vector<1x1xf32>
      %76 = math.rsqrt %75 : vector<1x1xf32>
      %77 = vector.broadcast %76 : vector<1x1xf32> to vector<1x128xf32>
      %78 = arith.mulf %73, %77 : vector<1x128xf32>
      %79 = arith.mulf %78, %0 : vector<1x128xf32>
      %80 = arith.addf %79, %1 : vector<1x128xf32>
      %81 = arith.mulf %53, %80 : vector<1x128xf32>
      %cst_37 = arith.constant dense<0.000000e+00> : vector<1xf32>
      %82 = vector.multi_reduction <add>, %81, %cst_37 [1] : vector<1x128xf32> to vector<1xf32>
      %83 = vector.shape_cast %82 : vector<1xf32> to vector<1x1xf32>
      %cst_38 = arith.constant 0.000000e+00 : f32
      %84 = vector.broadcast %cst_38 : f32 to vector<1x1xf32>
      %85 = arith.subf %84, %83 : vector<1x1xf32>
      %86 = vector.broadcast %cst_22 : f32 to vector<1x1xf32>
      %87 = arith.divf %85, %86 : vector<1x1xf32>
      %88 = arith.mulf %53, %53 : vector<1x128xf32>
      %cst_39 = arith.constant dense<0.000000e+00> : vector<1xf32>
      %89 = vector.multi_reduction <add>, %88, %cst_39 [1] : vector<1x128xf32> to vector<1xf32>
      %90 = vector.shape_cast %89 : vector<1xf32> to vector<1x1xf32>
      %91 = arith.mulf %80, %80 : vector<1x128xf32>
      %cst_40 = arith.constant dense<0.000000e+00> : vector<1xf32>
      %92 = vector.multi_reduction <add>, %91, %cst_40 [1] : vector<1x128xf32> to vector<1xf32>
      %93 = vector.shape_cast %92 : vector<1xf32> to vector<1x1xf32>
      %cst_41 = arith.constant 2.000000e+00 : f32
      %94 = vector.broadcast %cst_41 : f32 to vector<1x1xf32>
      %95 = arith.mulf %94, %90 : vector<1x1xf32>
      %96 = vector.broadcast %cst_22 : f32 to vector<1x1xf32>
      %97 = arith.subf %96, %95 : vector<1x1xf32>
      %98 = arith.mulf %90, %90 : vector<1x1xf32>
      %99 = arith.addf %97, %98 : vector<1x1xf32>
      %100 = arith.mulf %cst_22, %cst_22 : f32
      %101 = vector.broadcast %100 : f32 to vector<1x1xf32>
      %102 = arith.divf %99, %101 : vector<1x1xf32>
      %cst_42 = arith.constant 2.000000e+00 : f32
      %103 = vector.broadcast %cst_42 : f32 to vector<1x1xf32>
      %104 = arith.mulf %103, %93 : vector<1x1xf32>
      %105 = vector.broadcast %cst_22 : f32 to vector<1x1xf32>
      %106 = arith.subf %105, %104 : vector<1x1xf32>
      %107 = arith.mulf %93, %93 : vector<1x1xf32>
      %108 = arith.addf %106, %107 : vector<1x1xf32>
      %109 = arith.mulf %cst_22, %cst_22 : f32
      %110 = vector.broadcast %109 : f32 to vector<1x1xf32>
      %111 = arith.divf %108, %110 : vector<1x1xf32>
      %112 = arith.addf %102, %111 : vector<1x1xf32>
      %cst_43 = arith.constant 1.000000e-01 : f32
      %113 = vector.broadcast %cst_43 : f32 to vector<1x1xf32>
      %114 = arith.mulf %113, %112 : vector<1x1xf32>
      %115 = arith.addf %87, %114 : vector<1x1xf32>
      %c0_44 = arith.constant 0 : index
      %c0_45 = arith.constant 0 : index
      %116 = vector.load %arg9[%c0_44, %c0_45] : memref<128x128xf32, #tpu.memory_space<vmem>>, vector<128x128xf32>
      %cst_46 = arith.constant dense<0.000000e+00> : vector<1x128xf32>
      %117 = tpu.matmul %53, %116, %cst_46 {dimension_numbers = #tpu.dot_dimension_numbers<[1], [0], [0], [1], [0, 0, 1, 1], [], []>} : vector<1x128xf32>, vector<128x128xf32>, vector<1x128xf32> -> vector<1x128xf32>
      %c0_47 = arith.constant 0 : index
      %c0_48 = arith.constant 0 : index
      %118 = vector.load %arg10[%c0_47, %c0_48] : memref<128x128xf32, #tpu.memory_space<vmem>>, vector<128x128xf32>
      %cst_49 = arith.constant dense<0.000000e+00> : vector<1x128xf32>
      %119 = tpu.matmul %80, %118, %cst_49 {dimension_numbers = #tpu.dot_dimension_numbers<[1], [0], [0], [1], [0, 0, 1, 1], [], []>} : vector<1x128xf32>, vector<128x128xf32>, vector<1x128xf32> -> vector<1x128xf32>
      %120 = arith.addf %117, %119 : vector<1x128xf32>
      %c0_50 = arith.constant 0 : index
      %c0_51 = arith.constant 0 : index
      %121 = vector.load %arg11[%c0_50, %c0_51] : memref<1x128xf32, #tpu.memory_space<vmem>>, vector<1x128xf32>
      %122 = arith.addf %120, %121 : vector<1x128xf32>
      %cst_52 = arith.constant 0.000000e+00 : f32
      %123 = vector.broadcast %cst_52 : f32 to vector<1x128xf32>
      %124 = arith.maximumf %122, %123 : vector<1x128xf32>
      %c0_53 = arith.constant 0 : index
      %c0_54 = arith.constant 0 : index
      %125 = vector.load %arg12[%c0_53, %c0_54] : memref<1x128xf32, #tpu.memory_space<vmem>>, vector<1x128xf32>
      %126 = arith.mulf %124, %125 : vector<1x128xf32>
      %cst_55 = arith.constant dense<0.000000e+00> : vector<1xf32>
      %127 = vector.multi_reduction <add>, %126, %cst_55 [1] : vector<1x128xf32> to vector<1xf32>
      %128 = vector.shape_cast %127 : vector<1xf32> to vector<1x1xf32>
      %c0_56 = arith.constant 0 : index
      %c0_57 = arith.constant 0 : index
      %129 = vector.load %arg13[%c0_56, %c0_57] : memref<1x1xf32, #tpu.memory_space<vmem>>, vector<1x1xf32>
      %130 = arith.addf %128, %129 : vector<1x1xf32>
      %cst_58 = arith.constant 0.000000e+00 : f32
      %131 = vector.broadcast %cst_58 : f32 to vector<1x1xf32>
      %132 = arith.maximumf %130, %131 : vector<1x1xf32>
      %133 = tpu.iota {dimensions = array<i32: 1>} : vector<1x128xi32>
      %c0_i32_59 = arith.constant 0 : i32
      %134 = vector.broadcast %c0_i32_59 : i32 to vector<1x128xi32>
      %135 = arith.cmpi eq, %133, %134 : vector<1x128xi32>
      %c1_i32 = arith.constant 1 : i32
      %136 = vector.broadcast %c1_i32 : i32 to vector<1x128xi32>
      %137 = arith.cmpi eq, %133, %136 : vector<1x128xi32>
      %cst_60 = arith.constant 0.000000e+00 : f32
      %138 = vector.shape_cast %115 : vector<1x1xf32> to vector<1x1xf32>
      %139 = vector.broadcast %138 : vector<1x1xf32> to vector<1x128xf32>
      %140 = vector.broadcast %cst_60 : f32 to vector<1x128xf32>
      %141 = arith.select %137, %139, %140 : vector<1x128xi1>, vector<1x128xf32>
      %142 = vector.shape_cast %132 : vector<1x1xf32> to vector<1x1xf32>
      %143 = vector.broadcast %142 : vector<1x1xf32> to vector<1x128xf32>
      %144 = arith.select %135, %143, %141 : vector<1x128xi1>, vector<1x128xf32>
      %c0_61 = arith.constant 0 : index
      %c0_62 = arith.constant 0 : index
      %145 = vector.load %arg14[%c0_61, %c0_62] : memref<1x128xf32, #tpu.memory_space<vmem>>, vector<1x128xf32>
      tpu.vector_store %arg14[%c0_61, %c0_62], %144 {strides = array<i32>} : memref<1x128xf32, #tpu.memory_space<vmem>>, vector<1x128xf32>,
    } else {
    }
    return
  }
  func.func @transform_0(%arg0: i32) -> (i32, i32) {
    %c0_i32 = arith.constant 0 : i32
    %c0_i32_0 = arith.constant 0 : i32
    return %arg0, %c0_i32 : i32, i32
  }
  func.func @transform_1(%arg0: i32) -> (i32, i32) {
    %c0_i32 = arith.constant 0 : i32
    %c0_i32_0 = arith.constant 0 : i32
    %c0_i32_1 = arith.constant 0 : i32
    return %c0_i32, %c0_i32_0 : i32, i32
  }
  func.func @transform_2(%arg0: i32) -> (i32, i32) {
    %c0_i32 = arith.constant 0 : i32
    %c0_i32_0 = arith.constant 0 : i32
    %c0_i32_1 = arith.constant 0 : i32
    return %c0_i32, %c0_i32_0 : i32, i32
  }
  func.func @transform_3(%arg0: i32) -> (i32, i32) {
    %c0_i32 = arith.constant 0 : i32
    %c0_i32_0 = arith.constant 0 : i32
    %c0_i32_1 = arith.constant 0 : i32
    return %c0_i32, %c0_i32_0 : i32, i32
  }
  func.func @transform_4(%arg0: i32) -> (i32, i32) {
    %c0_i32 = arith.constant 0 : i32
    %c0_i32_0 = arith.constant 0 : i32
    %c0_i32_1 = arith.constant 0 : i32
    return %c0_i32, %c0_i32_0 : i32, i32
  }
  func.func @transform_5(%arg0: i32) -> (i32, i32) {
    %c0_i32 = arith.constant 0 : i32
    %c0_i32_0 = arith.constant 0 : i32
    %c0_i32_1 = arith.constant 0 : i32
    return %c0_i32, %c0_i32_0 : i32, i32
  }
  func.func @transform_6(%arg0: i32) -> (i32, i32) {
    %c0_i32 = arith.constant 0 : i32
    %c0_i32_0 = arith.constant 0 : i32
    %c0_i32_1 = arith.constant 0 : i32
    return %c0_i32, %c0_i32_0 : i32, i32
  }
  func.func @transform_7(%arg0: i32) -> (i32, i32) {
    %c0_i32 = arith.constant 0 : i32
    %c0_i32_0 = arith.constant 0 : i32
    %c0_i32_1 = arith.constant 0 : i32
    return %c0_i32, %c0_i32_0 : i32, i32
  }
  func.func @transform_8(%arg0: i32) -> (i32, i32) {
    %c0_i32 = arith.constant 0 : i32
    %c0_i32_0 = arith.constant 0 : i32
    %c0_i32_1 = arith.constant 0 : i32
    return %c0_i32, %c0_i32_0 : i32, i32
  }
  func.func @transform_9(%arg0: i32) -> (i32, i32) {
    %c0_i32 = arith.constant 0 : i32
    %c0_i32_0 = arith.constant 0 : i32
    %c0_i32_1 = arith.constant 0 : i32
    return %c0_i32, %c0_i32_0 : i32, i32
  }
  func.func @transform_10(%arg0: i32) -> (i32, i32) {
    %c0_i32 = arith.constant 0 : i32
    %c0_i32_0 = arith.constant 0 : i32
    %c0_i32_1 = arith.constant 0 : i32
    return %c0_i32, %c0_i32_0 : i32, i32
  }
  func.func @transform_11(%arg0: i32) -> (i32, i32) {
    %c0_i32 = arith.constant 0 : i32
    %c0_i32_0 = arith.constant 0 : i32
    %c0_i32_1 = arith.constant 0 : i32
    return %c0_i32, %c0_i32_0 : i32, i32
  }
  func.func @transform_12(%arg0: i32) -> (i32, i32) {
    %c0_i32 = arith.constant 0 : i32
    %c0_i32_0 = arith.constant 0 : i32
    %c0_i32_1 = arith.constant 0 : i32
    return %c0_i32, %c0_i32_0 : i32, i32
  }
  func.func @transform_13(%arg0: i32) -> (i32, i32) {
    %c0_i32 = arith.constant 0 : i32
    %c0_i32_0 = arith.constant 0 : i32
    %c0_i32_1 = arith.constant 0 : i32
    return %c0_i32, %c0_i32_0 : i32, i32
  }
}

</mosaic_0001>

<bundles_post_ra>
// kernel: tpu_custom_call.1
= control target key start
LH: loop header
LB: loop body
LE: loop exit
PB: predicated region body
PF: predicated region fallthrough
CT: control target
= control target key end

     0   :  { %s2455_s0 = inlined_call_operand.vmem [shape: f32[500,32], index: 0, kind: input, shape index: {}]   ;;  %s2456_s1 = inlined_call_operand.vmem [shape: f32[1,16], index: 1, kind: input, shape index: {}]   ;;  %s2457_s2 = inlined_call_operand.vmem [shape: f32[32,128], index: 2, kind: input, shape index: {}]   ;;  %s2458_s3 = inlined_call_operand.vmem [shape: f32[1,128], index: 3, kind: input, shape index: {}]   ;;  %s2459_s4 = inlined_call_operand.vmem [shape: f32[16,128], index: 4, kind: input, shape index: {}]   ;;  %s2460_s5 = inlined_call_operand.vmem [shape: f32[1,128], index: 5, kind: input, shape index: {}]   ;;  %s2461_s6 = inlined_call_operand.vmem [shape: f32[1,128], index: 6, kind: input, shape index: {}]   ;;  %s2462_s7 = inlined_call_operand.vmem [shape: f32[1,128], index: 7, kind: input, shape index: {}]   ;;  %s2463_s8 = inlined_call_operand.vmem [shape: f32[128,128], index: 8, kind: input, shape index: {}]   ;;  %s2464_s9 = inlined_call_operand.vmem [shape: f32[128,128], index: 9, kind: input, shape index: {}]   ;;  %s2465_s10 = inlined_call_operand.vmem [shape: f32[1,128], index: 10, kind: input, shape index: {}]   ;;  %s2466_s11 = inlined_call_operand.vmem [shape: f32[1,128], index: 11, kind: input, shape index: {}]   ;;  %s2467_s12 = inlined_call_operand.<no memory space> [shape: f32[1,1], index: 12, kind: input, shape index: {}]   ;;  %s2468_s13 = inlined_call_operand.hbm [shape: f32[1,128], index: 13, kind: output, shape index: {}]  }
   0x1   :  { %v18_v0 = vstv %s2467_s12 }
   0x2   :  { %19 = vst [vmem:[#allocation3] sm:$0x1] %v18_v0 }
   0x3   :  { %20 = vsyncpa [#allocation5], 0  ;;  %s1589_s27 = smov 0  }
   0x4 LB: > { %s1595_s28 = sadd.s32 4294967295, %s1509_s27   ;;  %p1373_p0 = scmp.ge.s32.totalorder %s1509_s27, 1  ;;  %s1509_s27 = sphi %s1589_s27, %s26_s27  }
   0x5   : > { %p394_p1 = scmp.lt.s32.totalorder %s1509_s27, 5 }
   0x7   : > { %p395_p2 = pnand %p1373_p0, %p394_p1 }
   0x9   : > { %398 = sbr.rel (%p395_p2) target bundleno = 1082 (0x43a), region = 72 }
   0xe   : > { %s1374_s12 = sshll.u32 %s1595_s28, 4  ;;  %v1603_v1 = vld [vmem:[%s2461_s6] sm:$0x1]  ;;  %p1376_p4 = scmp.ne.s32.totalorder %s1595_s28, 0 }
   0xf   : > { %2474 = vst [vmem:[#allocation7_spill] sm:$0xff] %v1603_v1  ;;  %v1608_v2 = vld [vmem:[%s2462_s7] sm:$0x1]  ;;  %p442_p3 = scmp.lt.s32.totalorder %s1374_s12, 62 }
  0x10   : > { %2475 = vst [vmem:[#allocation8_spill] sm:$0xff] %v1608_v2  ;;  %456 = sbr.rel (%p1376_p4) target bundleno = 23 (0x17), region = 76 }
  0x11   : > { %s2511_s12 = smov (!%p442_p3, %s1374_s12), 62 }
  0x12   : > { %s1375_s16 = sshll.u32 %s2511_s12, 3 }
  0x13   : > { %s1613_s19 = scalar_lea.vmem %s2455_s0, %s1375_s16 }
  0x15   : > { %v1511_v3 = vmov 0.0  }
  0x16   : > { %457 = vst [vmem:[#allocation2] sm:$0x1] %v1511_v3 }
  0x17 PF: > { %v477_v4 = vld [vmem:[%s2457_s2 + $0x18] sm:$0xff]  ;;  %v476_v5 = vld [vmem:[%s2457_s2 + $0x10] sm:$0xff]  ;;  %v475_v6 = vld [vmem:[%s2457_s2 + $0x8] sm:$0xff]  ;;  %vm482_vm0 = vcmask 261120   ;;  %s1393_s14 = sshll.u32 %s1595_s28, 7  ;;  %p1394_p5 = scmp.ne.s32.totalorder %s1595_s28, 3 }
  0x18   : > { %543 = vmatpush.msra.mxu0 %v477_v4  ;;  %1400 = vmatpush.msra.mxu1 %v477_v4  ;;  %v474_v7 = vld [vmem:[%s2457_s2] sm:$0xff]  ;;  %v459_v12 = vld [vmem:[%s1613_s19 + $0x8] sm:$0xff]  ;;  %v460_v16 = vld [vmem:[%s1613_s19 + $0x10] sm:$0xff] }
  0x19   : > { %1401 = vmatpush.msra.mxu2 %v477_v4  ;;  %1402 = vmatpush.msra.mxu3 %v477_v4  ;;  %v458_v8 = vld [vmem:[%s1613_s19] sm:$0xff]  ;;  %v463_v13 = vld [vmem:[%s1613_s19 + $0x28] sm:$0xff]  ;;  %v464_v17 = vld [vmem:[%s1613_s19 + $0x30] sm:$0xff] }
  0x1a   : > { %544 = vmatpush.msra.mxu0 %v476_v5  ;;  %1403 = vmatpush.msra.mxu1 %v476_v5  ;;  %v462_v9 = vld [vmem:[%s1613_s19 + $0x20] sm:$0xff]  ;;  %v467_v14 = vld [vmem:[%s1613_s19 + $0x48] sm:$0xff]  ;;  %v468_v18 = vld [vmem:[%s1613_s19 + $0x50] sm:$0xff] }
  0x1b   : > { %1404 = vmatpush.msra.mxu2 %v476_v5  ;;  %1405 = vmatpush.msra.mxu3 %v476_v5  ;;  %v466_v10 = vld [vmem:[%s1613_s19 + $0x40] sm:$0xff]  ;;  %v471_v15 = vld [vmem:[%s1613_s19 + $0x68] sm:$0xff]  ;;  %v472_v19 = vld [vmem:[%s1613_s19 + $0x70] sm:$0xff] }
  0x1c   : > { %545 = vmatpush.msra.mxu0 %v475_v6  ;;  %1406 = vmatpush.msra.mxu1 %v475_v6  ;;  %v470_v11 = vld [vmem:[%s1613_s19 + $0x60] sm:$0xff]  ;;  %v465_v20 = vld [vmem:[%s1613_s19 + $0x38] sm:$0xff] }
  0x1d   : > { %1407 = vmatpush.msra.mxu2 %v475_v6  ;;  %1408 = vmatpush.msra.mxu3 %v475_v6  ;;  %v461_v21 = vld [vmem:[%s1613_s19 + $0x18] sm:$0xff]  ;;  %v1663_v24 = vld [vmem:[%s2458_s3] ss:$0 sm:$0xff] }
  0x1e   : > { %546 = vmatpush.msra.mxu0 %v474_v7  ;;  %1409 = vmatpush.msra.mxu1 %v474_v7  ;;  %v469_v22 = vld [vmem:[%s1613_s19 + $0x58] sm:$0xff] }
  0x1f   : > { %1377 = vmatmul.msk.f32.vlgmr.msra.gmra.mxu0 %vm482_vm0, %v458_v8  ;;  %1381 = vmatmul.msk.f32.vlgmr.msra.gmra.mxu1 %vm482_vm0, %v462_v9  ;;  %v473_v23 = vld [vmem:[%s1613_s19 + $0x78] sm:$0xff] }
  0x20   : > { %1410 = vmatpush.msra.mxu2 %v474_v7  ;;  %1411 = vmatpush.msra.mxu3 %v474_v7 }
  0x21   : > { %1385 = vmatmul.msk.f32.vlgmr.msra.gmra.mxu2 %vm482_vm0, %v466_v10  ;;  %1389 = vmatmul.msk.f32.vlgmr.msra.gmra.mxu3 %vm482_vm0, %v470_v11  ;;  %v1512_v11 = vmov 128.0  }
  0x22   : > { %1432 = vrcp.f32 %v1512_v11 }
  0x27   : > { %1378 = vmatmul.msk.f32.gmra.mxu0 %vm482_vm0, %v459_v12  ;;  %1382 = vmatmul.msk.f32.gmra.mxu1 %vm482_vm0, %v463_v13 }
  0x28   : > { %v1433_v12 = vpop.eup %1432 }
  0x29   : > { %1386 = vmatmul.msk.f32.gmra.mxu2 %vm482_vm0, %v467_v14  ;;  %1390 = vmatmul.msk.f32.gmra.mxu3 %vm482_vm0, %v471_v15  ;;  %v677_v13 = vmul.f32 128.0, %v1433_v12  ;;  %vm681_vm1 = vweird.f32 %v1433_v12 }
  0x2b   : > { %v678_v14 = vsub.f32 1.0, %v677_v13 }
  0x2d   : > { %v679_v15 = vmul.f32 %v1433_v12, %v678_v14  ;;  %v2469_v14 = vlaneseq }
  0x2f   : > { %1379 = vmatmul.msk.f32.gmra.mxu0 %vm482_vm0, %v460_v16  ;;  %1383 = vmatmul.msk.f32.gmra.mxu1 %vm482_vm0, %v464_v17  ;;  %v680_v16 = vadd.f32 %v1433_v12, %v679_v15 }
  0x31   : > { %1387 = vmatmul.msk.f32.gmra.mxu2 %vm482_vm0, %v468_v18  ;;  %1391 = vmatmul.msk.f32.gmra.mxu3 %vm482_vm0, %v472_v19  ;;  %v1761_v19 = vsel %vm681_vm1, %v1433_v12, %v680_v16 }
  0x37   : > { %1384 = vmatmul.msk.f32.gmra.mxu1 %vm482_vm0, %v465_v20  ;;  %1380 = vmatmul.msk.f32.gmra.mxu0 %vm482_vm0, %v461_v21 }
  0x39   : > { %1388 = vmatmul.msk.f32.gmra.mxu2 %vm482_vm0, %v469_v22  ;;  %1392 = vmatmul.msk.f32.gmra.mxu3 %vm482_vm0, %v473_v23 }
  0x9c   : > { %v548_v25 = vpop.f32.mrf.mxu0  ;;  %v560_v26 = vpop.f32.mrf.mxu1 }
  0x9d   : > { %v1666_v27 = vadd.f32 %v1663_v24, %v548_v25  ;;  %v1669_v28 = vadd.f32 %v1663_v24, %v560_v26 }
  0x9f   : > { %604 = vadd.xlane.f32.xlu1 %v1669_v28  ;;  %596 = vadd.xlane.f32.xlu0 %v1666_v27  ;;  %v628_v33 = vmul.f32 %v1666_v27, %v1666_v27  ;;  %v632_v38 = vmul.f32 %v1669_v28, %v1669_v28 }
  0xa4   : > { %v551_v29 = vpop.f32.mrf.mxu0  ;;  %v572_v30 = vpop.f32.mrf.mxu2 }
  0xa5   : > { %v1674_v31 = vadd.f32 %v1663_v24, %v551_v29  ;;  %v1677_v32 = vadd.f32 %v1663_v24, %v572_v30  ;;  %v563_v35 = vpop.f32.mrf.mxu1  ;;  %v584_v46 = vpop.f32.mrf.mxu3 }
  0xa6   : > { %v1695_v42 = vadd.f32 %v1663_v24, %v563_v35  ;;  %v1743_v3 = vadd.f32 %v1663_v24, %v584_v46 }
  0xa7   : > { %612 = vadd.xlane.f32.xlu0 %v1677_v32  ;;  %644 = vadd.xlane.f32.xlu1 %v628_v33  ;;  %v629_v34 = vmul.f32 %v1674_v31, %v1674_v31  ;;  %v636_v47 = vmul.f32 %v1677_v32, %v1677_v32 }
  0xa8   : > { %v633_v51 = vmul.f32 %v1695_v42, %v1695_v42  ;;  %v640_v7 = vmul.f32 %v1743_v3, %v1743_v3 }
  0xa9   : > { %646 = vadd.xlane.f32.xlu2 %v629_v34 }
  0xac   : > { %v575_v36 = vpop.f32.mrf.mxu2  ;;  %v554_v39 = vpop.f32.mrf.mxu0 }
  0xad   : > { %v1685_v37 = vadd.f32 %v1663_v24, %v575_v36  ;;  %v566_v40 = vpop.f32.mrf.mxu1  ;;  %v1692_v41 = vadd.f32 %v1663_v24, %v554_v39  ;;  %v587_v52 = vpop.f32.mrf.mxu3 }
  0xae   : > { %v1698_v43 = vadd.f32 %v1663_v24, %v566_v40  ;;  %v1731_v60 = vadd.f32 %v1663_v24, %v587_v52 }
  0xaf   : > { %598 = vadd.xlane.f32.xlu0 %v1674_v31  ;;  %652 = vadd.xlane.f32.xlu1 %v632_v38  ;;  %v637_v48 = vmul.f32 %v1685_v37, %v1685_v37  ;;  %v630_v56 = vmul.f32 %v1692_v41, %v1692_v41 }
  0xb0   : > { %v634_v53 = vmul.f32 %v1698_v43, %v1698_v43  ;;  %v641_v6 = vmul.f32 %v1731_v60, %v1731_v60 }
  0xb1   : > { %614 = vadd.xlane.f32.xlu2 %v1685_v37 }
  0xb4   : > { %v578_v44 = vpop.f32.mrf.mxu2  ;;  %v557_v54 = vpop.f32.mrf.mxu0 }
  0xb5   : > { %v1704_v45 = vadd.f32 %v1663_v24, %v578_v44  ;;  %v569_v49 = vpop.f32.mrf.mxu1  ;;  %v1720_v55 = vadd.f32 %v1663_v24, %v557_v54  ;;  %v590_v58 = vpop.f32.mrf.mxu3 }
  0xb6   : > { %v1712_v50 = vadd.f32 %v1663_v24, %v569_v49  ;;  %v1728_v59 = vadd.f32 %v1663_v24, %v590_v58 }
  0xb7   : > { %606 = vadd.xlane.f32.xlu0 %v1695_v42  ;;  %600 = vadd.xlane.f32.xlu1 %v1692_v41  ;;  %v638_v57 = vmul.f32 %v1704_v45, %v1704_v45  ;;  %v631_v61 = vmul.f32 %v1720_v55, %v1720_v55 }
  0xb8   : > { %2476 = vst [vmem:[#allocation9_spill] sm:$0xff] %v1728_v59  ;;  %v635_v0 = vmul.f32 %v1712_v50, %v1712_v50  ;;  %v642_v10 = vmul.f32 %v1728_v59, %v1728_v59 }
  0xb9   : > { %608 = vadd.xlane.f32.xlu2 %v1698_v43 }
  0xbc   : > { %v581_v62 = vpop.f32.mrf.mxu2 }
  0xbd   : > { %v1738_v63 = vadd.f32 %v1663_v24, %v581_v62  ;;  %v593_v4 = vpop.f32.mrf.mxu3 }
  0xbe   : > { %v1754_v8 = vadd.f32 %v1663_v24, %v593_v4 }
  0xbf   : > { %660 = vadd.xlane.f32.xlu0 %v636_v47  ;;  %616 = vadd.xlane.f32.xlu1 %v1704_v45  ;;  %v639_v5 = vmul.f32 %v1738_v63, %v1738_v63 }
  0xc0   : > { %2477 = vst [vmem:[#allocation10_spill] sm:$0xff] %v1754_v8  ;;  %v643_v9 = vmul.f32 %v1754_v8, %v1754_v8 }
  0xc1   : > { %662 = vadd.xlane.f32.xlu2 %v637_v48 }
  0xc7   : > { %654 = vadd.xlane.f32.xlu0 %v633_v51  ;;  %610 = vadd.xlane.f32.xlu1 %v1712_v50 }
  0xc9   : > { %656 = vadd.xlane.f32.xlu2 %v634_v53 }
  0xcf   : > { %648 = vadd.xlane.f32.xlu0 %v630_v56  ;;  %664 = vadd.xlane.f32.xlu1 %v638_v57 }
  0xd1   : > { %602 = vadd.xlane.f32.xlu2 %v1720_v55 }
  0xd7   : > { %624 = vadd.xlane.f32.xlu0 %v1728_v59  ;;  %622 = vadd.xlane.f32.xlu1 %v1731_v60 }
  0xd9   : > { %650 = vadd.xlane.f32.xlu2 %v631_v61 }
  0xdf   : > { %618 = vadd.xlane.f32.xlu0 %v1738_v63  ;;  %658 = vadd.xlane.f32.xlu1 %v635_v0 }
  0xe1   : > { %620 = vadd.xlane.f32.xlu2 %v1743_v3 }
  0xe7   : > { %666 = vadd.xlane.f32.xlu0 %v639_v5  ;;  %670 = vadd.xlane.f32.xlu1 %v641_v6 }
  0xe9   : > { %668 = vadd.xlane.f32.xlu2 %v640_v7 }
  0xef   : > { %672 = vadd.xlane.f32.xlu0 %v642_v10  ;;  %674 = vadd.xlane.f32.xlu1 %v643_v9 }
  0xf1   : > { %626 = vadd.xlane.f32.xlu2 %v1754_v8 }
 0x112   : > { %v605_v17 = vpop.xlane.xlu1 %604  ;;  %v597_v18 = vpop.xlane.xlu0 %596 }
 0x113   : > { %v1764_v20 = vmul.f32 %v1761_v19, %v597_v18  ;;  %v1770_v30 = vmul.f32 %v1761_v19, %v605_v17 }
 0x115   : > { %v715_v23 = vmul.f32 %v1764_v20, %v1764_v20  ;;  %v719_v36 = vmul.f32 %v1770_v30, %v1770_v30 }
 0x11a   : > { %v613_v21 = vpop.xlane.xlu0 %612  ;;  %v645_v22 = vpop.xlane.xlu1 %644 }
 0x11b   : > { %v699_v24 = vmul.f32 %v1761_v19, %v645_v22  ;;  %v1800_v4 = vmul.f32 %v1761_v19, %v613_v21 }
 0x11c   : > { %v647_v25 = vpop.xlane.xlu2 %646 }
 0x11d   : > { %v731_v26 = vsub.f32 %v699_v24, %v715_v23  ;;  %v700_v44 = vmul.f32 %v1761_v19, %v647_v25  ;;  %v723_v11 = vmul.f32 %v1800_v4, %v1800_v4 }
 0x11f   : > { %v747_v29 = vmax.f32 %v731_v26, 0.0 }
 0x121   : > { %v1772_v33 = vadd.f32 1e-05, %v747_v29  ;;  %v1823_v29 = vshrl.u32 %v2469_v14, 7 }
 0x122   : > { %v599_v34 = vpop.xlane.xlu0 %598  ;;  %v653_v35 = vpop.xlane.xlu1 %652 }
 0x123   : > { %1434 = vrsqrt.f32 %v1772_v33  ;;  %v1778_v38 = vmul.f32 %v1761_v19, %v599_v34  ;;  %v703_v39 = vmul.f32 %v1761_v19, %v653_v35  ;;  %vm801_vm3 = vweird.f32 %v1772_v33 }
 0x124   : > { %v615_v40 = vpop.xlane.xlu2 %614 }
 0x125   : > { %v716_v46 = vmul.f32 %v1778_v38, %v1778_v38  ;;  %v735_v47 = vsub.f32 %v703_v39, %v719_v36  ;;  %v1805_v6 = vmul.f32 %v1761_v19, %v615_v40  ;;  %v767_v39 = vsub.f32 %v1669_v28, %v1770_v30 }
 0x126   : > { %v763_v40 = vsub.f32 %v1666_v27, %v1764_v20 }
 0x127   : > { %v732_v48 = vsub.f32 %v700_v44, %v716_v46  ;;  %v751_v49 = vmax.f32 %v735_v47, 0.0  ;;  %v724_v22 = vmul.f32 %v1805_v6, %v1805_v6  ;;  %v1833_v44 = vperm.slane %v1603_v1, 0 }
 0x128   : > { %v1012_v47 = vadd.s32 8, %v1823_v29 }
 0x129   : > { %v1784_v51 = vpop.eup %1434  ;;  %v748_v52 = vmax.f32 %v732_v48, 0.0  ;;  %v1786_v53 = vadd.f32 1e-05, %v751_v49  ;;  %v1838_v48 = vstv %s1393_s14 }
 0x12a   : > { %v607_v54 = vpop.xlane.xlu0 %606  ;;  %v1788_v56 = vpop.xlane.xlu1 %600  ;;  %v796_v57 = vmul.f32 %v1784_v51, %v1772_v33  ;;  %vm802_vm2 = vweird.f32 %v1784_v51 }
 0x12b   : > { %v1792_v58 = vadd.f32 1e-05, %v748_v52  ;;  %1436 = vrsqrt.f32 %v1786_v53  ;;  %v1826_v35 = vmul.f32 %v1761_v19, %v607_v54  ;;  %vm1859_vm4 = vmor %vm801_vm3, %vm802_vm2  ;;  %vm841_vm8 = vweird.f32 %v1786_v53 }
 0x12c   : > { %v609_v61 = vpop.xlane.xlu2 %608  ;;  %v797_v62 = vmul.f32 %v1784_v51, %v796_v57 }
 0x12d   : > { %1438 = vrsqrt.f32 %v1792_v58  ;;  %v1841_v49 = vmul.f32 %v1761_v19, %v609_v61  ;;  %vm811_vm7 = vweird.f32 %v1792_v58 }
 0x12e   : > { %v798_v12 = vmul.f32 0.5, %v797_v62 }
 0x130   : > { %v799_v24 = vsub.f32 1.5, %v798_v12  ;;  %v1855_v12 = vperm.slane %v1608_v2, 0 }
 0x131   : > { %v1797_v0 = vpop.eup %1436 }
 0x132   : > { %v836_v5 = vmul.f32 %v1797_v0, %v1786_v53  ;;  %v661_v7 = vpop.xlane.xlu0 %660  ;;  %v1807_v9 = vpop.xlane.xlu1 %616  ;;  %v800_v62 = vmul.f32 %v1784_v51, %v799_v24  ;;  %vm842_vm5 = vweird.f32 %v1797_v0 }
 0x133   : > { %v1809_v10 = vpop.eup %1438  ;;  %v707_v13 = vmul.f32 %v1761_v19, %v661_v7  ;;  %vm1888_vm9 = vmor %vm841_vm8, %vm842_vm5 }
 0x134   : > { %v806_v15 = vmul.f32 %v1809_v10, %v1792_v58  ;;  %v837_v16 = vmul.f32 %v1797_v0, %v836_v5  ;;  %v663_v17 = vpop.xlane.xlu2 %662  ;;  %v720_v5 = vmul.f32 %v1826_v35, %v1826_v35  ;;  %vm812_vm6 = vweird.f32 %v1809_v10 }
 0x135   : > { %v739_v18 = vsub.f32 %v707_v13, %v723_v11  ;;  %v708_v23 = vmul.f32 %v1761_v19, %v663_v17  ;;  %v1015_v13 = vadd.s32 32, %v1823_v29  ;;  %v1865_v17 = vadd.s32 %v1838_v48, %v1823_v29  ;;  %vm1899_vm11 = vmor %vm811_vm7, %vm812_vm6 }
 0x136   : > { %v807_v21 = vmul.f32 %v1809_v10, %v806_v15  ;;  %v838_v25 = vmul.f32 0.5, %v837_v16 }
 0x137   : > { %v755_v26 = vmax.f32 %v739_v18, 0.0  ;;  %v740_v36 = vsub.f32 %v708_v23, %v724_v22  ;;  %v721_v18 = vmul.f32 %v1841_v49, %v1841_v49  ;;  %v1874_v22 = vadd.s32 %v1838_v48, %v1012_v47 }
 0x138   : > { %v808_v34 = vmul.f32 0.5, %v807_v21  ;;  %v839_v27 = vsub.f32 1.5, %v838_v25  ;;  %v804_v21 = vsel %vm1859_vm4, %v1784_v51, %v800_v62  ;;  %v1019_v51 = vadd.s32 64, %v1823_v29 }
 0x139   : > { %v1835_v46 = vadd.f32 1e-05, %v755_v26  ;;  %v756_v52 = vmax.f32 %v740_v36, 0.0  ;;  %v1884_v36 = vadd.s32 %v1838_v48, %v1015_v13  ;;  %v955_v47 = vmul.f32 %v804_v21, %v763_v40 }
 0x13a   : > { %v655_v54 = vpop.xlane.xlu0 %654  ;;  %v1843_v57 = vpop.xlane.xlu1 %610  ;;  %v809_v20 = vsub.f32 1.5, %v808_v34  ;;  %v840_v23 = vmul.f32 %v1797_v0, %v839_v27  ;;  %vm1044_vm10 = vcmp.lt.s32.totalorder %v1865_v17, 500  ;;  %vm1045_vm12 = vcmp.lt.s32.totalorder %v1874_v22, 500 }
 0x13b   : > { %1440 = vrsqrt.f32 %v1835_v46  ;;  %v1850_v7 = vadd.f32 1e-05, %v756_v52  ;;  %v704_v61 = vmul.f32 %v1761_v19, %v655_v54  ;;  %vm1048_vm13 = vcmp.lt.s32.totalorder %v1884_v36, 500 }
 0x13c   : > { %v657_v11 = vpop.xlane.xlu2 %656  ;;  %v810_v24 = vmul.f32 %v1809_v10, %v809_v20  ;;  %v844_v40 = vsel %vm1888_vm9, %v1797_v0, %v840_v23  ;;  %v1946_v52 = vadd.s32 %v1838_v48, %v1019_v51  ;;  %vm881_vm15 = vweird.f32 %v1835_v46 }
 0x13d   : > { %v705_v15 = vmul.f32 %v1761_v19, %v657_v11  ;;  %1442 = vrsqrt.f32 %v1850_v7  ;;  %v736_v33 = vsub.f32 %v704_v61, %v720_v5  ;;  %v1908_v5 = vmul.f32 %v1761_v19, %v1788_v56 }
 0x13e   : > { %v1912_v61 = vmul.f32 %v1761_v19, %v1807_v9  ;;  %v764_v9 = vsub.f32 %v1674_v31, %v1778_v38  ;;  %v959_v31 = vmul.f32 %v844_v40, %v767_v39  ;;  %vm891_vm0 = vweird.f32 %v1850_v7 }
 0x13f   : > { %v752_v25 = vmax.f32 %v736_v33, 0.0  ;;  %v737_v26 = vsub.f32 %v705_v15, %v721_v18  ;;  %v814_v15 = vsel %vm1899_vm11, %v1809_v10, %v810_v24  ;;  %v717_v33 = vmul.f32 %v1908_v5, %v1908_v5 }
 0x140   : > { %v974_v10 = vmul.f32 %v1833_v44, %v955_v47  ;;  %v725_v23 = vmul.f32 %v1912_v61, %v1912_v61  ;;  %v1020_v24 = vadd.s32 72, %v1823_v29  ;;  %vm1052_vm7 = vcmp.lt.s32.totalorder %v1946_v52, 500 }
 0x141   : > { %v1880_v34 = vpop.eup %1440  ;;  %v1894_v62 = vadd.f32 1e-05, %v752_v25  ;;  %v753_v27 = vmax.f32 %v737_v26, 0.0  ;;  %v956_v25 = vmul.f32 %v814_v15, %v764_v9 }
 0x142   : > { %v876_v54 = vmul.f32 %v1880_v34, %v1835_v46  ;;  %v649_v20 = vpop.xlane.xlu0 %648  ;;  %v665_v58 = vpop.xlane.xlu1 %664  ;;  %v993_v53 = vadd.f32 %v1855_v12, %v974_v10  ;;  %vm882_vm14 = vweird.f32 %v1880_v34 }
 0x143   : > { %v701_v11 = vmul.f32 %v1761_v19, %v649_v20  ;;  %v1915_v13 = vpop.eup %1442  ;;  %1444 = vrsqrt.f32 %v1894_v62  ;;  %v1922_v0 = vadd.f32 1e-05, %v753_v27  ;;  %v709_v26 = vmul.f32 %v1761_v19, %v665_v58  ;;  %vm2018_vm1 = vmor %vm881_vm15, %vm882_vm14 }
 0x144   : > { %v877_v16 = vmul.f32 %v1880_v34, %v876_v54  ;;  %v603_v56 = vpop.xlane.xlu2 %602  ;;  %v886_v21 = vmul.f32 %v1915_v13, %v1850_v7  ;;  %v1016_v27 = vadd.s32 40, %v1823_v29  ;;  %v975_v9 = vmul.f32 %v1833_v44, %v956_v25 }
 0x145   : > { %1446 = vrsqrt.f32 %v1922_v0  ;;  %v733_v38 = vsub.f32 %v701_v11, %v717_v33  ;;  %v741_v20 = vsub.f32 %v709_v26, %v725_v23  ;;  %v1960_v11 = vadd.s32 %v1838_v48, %v1020_v24 }
 0x146   : > { %v878_v54 = vmul.f32 0.5, %v877_v16  ;;  %v887_v30 = vmul.f32 %v1915_v13, %v886_v21  ;;  %v978_v33 = vmul.f32 %v1833_v44, %v959_v31  ;;  %v1977_v26 = vadd.s32 %v1838_v48, %v1016_v27 }
 0x147   : > { %v749_v39 = vmax.f32 %v733_v38, 0.0  ;;  %v757_v14 = vmax.f32 %v741_v20, 0.0  ;;  %v1017_v31 = vadd.s32 48, %v1823_v29  ;;  %v1092_v28 = vsel %vm1044_vm10, %v993_v53, 0.0 }
 0x148   : > { %v879_v38 = vsub.f32 1.5, %v878_v54  ;;  %v888_v51 = vmul.f32 0.5, %v887_v30  ;;  %v1987_v54 = vmul.f32 %v1761_v19, %v1843_v57  ;;  %v994_v30 = vadd.f32 %v1855_v12, %v975_v9 }
 0x149   : > { %v1952_v58 = vpop.eup %1444  ;;  %v1970_v10 = vadd.f32 1e-05, %v749_v39  ;;  %v1990_v27 = vadd.f32 1e-05, %v757_v14  ;;  %v997_v20 = vadd.f32 %v1855_v12, %v978_v33  ;;  %v1013_v24 = vadd.s32 16, %v1823_v29 }
 0x14a   : > { %v1962_v15 = vpop.xlane.xlu0 %624  ;;  %v1964_v16 = vpop.xlane.xlu1 %622  ;;  %v846_v21 = vmul.f32 %v1952_v58, %v1894_v62  ;;  %v880_v47 = vmul.f32 %v1880_v34, %v879_v38  ;;  %v1999_v57 = vmul.f32 %v1761_v19, %v603_v56  ;;  %v889_v14 = vsub.f32 1.5, %v888_v51 }
 0x14b   : > { %v1972_v23 = vpop.eup %1446  ;;  %1448 = vrsqrt.f32 %v1970_v10  ;;  %v2003_v53 = vadd.s32 %v1838_v48, %v1017_v31  ;;  %v722_v9 = vmul.f32 %v1987_v54, %v1987_v54  ;;  %v1021_v38 = vadd.s32 80, %v1823_v29 }
 0x14c   : > { %v651_v40 = vpop.xlane.xlu2 %650  ;;  %v847_v25 = vmul.f32 %v1952_v58, %v846_v21  ;;  %v856_v39 = vmul.f32 %v1972_v23, %v1922_v0  ;;  %1450 = vrsqrt.f32 %v1990_v27  ;;  %v1093_v46 = vsel %vm1045_vm12, %v994_v30, 0.0 }
 0x14d   : > { %v2016_v51 = vsel %vm1048_vm13, %v997_v20, 0.0  ;;  %v884_v33 = vsel %vm2018_vm1, %v1880_v34, %v880_v47  ;;  %v2029_v30 = vadd.s32 %v1838_v48, %v1013_v24  ;;  %v718_v36 = vmul.f32 %v1999_v57, %v1999_v57 }
 0x14e   : > { %v848_v21 = vmul.f32 0.5, %v847_v25  ;;  %v857_v17 = vmul.f32 %v1972_v23, %v856_v39  ;;  %v702_v39 = vmul.f32 %v1761_v19, %v651_v40  ;;  %v890_v1 = vmul.f32 %v1915_v13, %v889_v14 }
 0x14f   : > { %vm892_vm2 = vweird.f32 %v1915_v13  ;;  %v2038_v8 = vadd.f32 %v1093_v46, %v1092_v28  ;;  %vm851_vm3 = vweird.f32 %v1894_v62  ;;  %v1014_v34 = vadd.s32 24, %v1823_v29 }
 0x150   : > { %v849_v31 = vsub.f32 1.5, %v848_v21  ;;  %v858_v22 = vmul.f32 0.5, %v857_v17  ;;  %v734_v47 = vsub.f32 %v702_v39, %v718_v36  ;;  %v2486_v17 = vsub.f32 %v1677_v32, %v1800_v4  ;;  %vm2052_vm5 = vmor %vm891_vm0, %vm892_vm2 }
 0x151   : > { %v2023_v2 = vpop.eup %1448  ;;  %vm852_vm4 = vweird.f32 %v1952_v58  ;;  %vm861_vm6 = vweird.f32 %v1922_v0  ;;  %v2058_v46 = vadd.s32 %v1838_v48, %v1021_v38  ;;  %v894_v4 = vsel %vm2052_vm5, %v1915_v13, %v890_v1 }
 0x152   : > { %v659_v56 = vpop.xlane.xlu1 %658  ;;  %v619_v18 = vpop.xlane.xlu0 %618  ;;  %v816_v40 = vmul.f32 %v2023_v2, %v1970_v10  ;;  %v963_v14 = vmul.f32 %v884_v33, %v2486_v17  ;;  %v850_v25 = vmul.f32 %v1952_v58, %v849_v31  ;;  %v750_v32 = vmax.f32 %v734_v47, 0.0  ;;  %vm2068_vm8 = vmor %vm851_vm3, %vm852_vm4 }
 0x153   : > { %v706_v21 = vmul.f32 %v1761_v19, %v659_v56  ;;  %v2042_v24 = vpop.eup %1450  ;;  %v859_v56 = vsub.f32 1.5, %v858_v22  ;;  %v766_v7 = vsub.f32 %v1720_v55, %v1999_v57  ;;  %v2076_v22 = vmul.f32 %v1761_v19, %v1962_v15 }
 0x154   : > { %v621_v20 = vpop.xlane.xlu2 %620  ;;  %v817_v59 = vmul.f32 %v2023_v2, %v816_v40  ;;  %v896_v38 = vmul.f32 %v2042_v24, %v1990_v27  ;;  %v2079_v1 = vadd.s32 %v1838_v48, %v1014_v34  ;;  %v982_v13 = vmul.f32 %v1833_v44, %v963_v14 }
 0x155   : > { %v738_v31 = vsub.f32 %v706_v21, %v722_v9  ;;  %v854_v62 = vsel %vm2068_vm8, %v1952_v58, %v850_v25  ;;  %v2491_v40 = vsub.f32 %v1685_v37, %v1805_v6  ;;  %v860_v15 = vmul.f32 %v1972_v23, %v859_v56 }
 0x156   : > { %v818_v33 = vmul.f32 0.5, %v817_v59  ;;  %v2081_v59 = vadd.f32 1e-05, %v750_v32  ;;  %vm862_vm9 = vweird.f32 %v1972_v23  ;;  %vm822_vm10 = vweird.f32 %v2023_v2 }
 0x157   : > { %v754_v36 = vmax.f32 %v738_v31, 0.0  ;;  %v964_v21 = vmul.f32 %v894_v4, %v2491_v40  ;;  %v2097_v47 = vmul.f32 %v1761_v19, %v1964_v16  ;;  %v2492_v37 = vsub.f32 %v1695_v42, %v1826_v35  ;;  %vm2112_vm12 = vmor %vm861_vm6, %vm862_vm9 }
 0x158   : > { %v819_v9 = vsub.f32 1.5, %v818_v33  ;;  %1452 = vrsqrt.f32 %v2081_v59  ;;  %vm821_vm11 = vweird.f32 %v1970_v10  ;;  %v897_v14 = vmul.f32 %v2042_v24, %v896_v38 }
 0x159   : > { %v2099_v58 = vadd.f32 1e-05, %v754_v36  ;;  %v960_v6 = vmul.f32 %v854_v62, %v2492_v37  ;;  %v2107_v25 = vmul.f32 %v1761_v19, %v619_v18  ;;  %v1001_v32 = vadd.f32 %v1855_v12, %v982_v13  ;;  %vm2130_vm13 = vmor %vm821_vm11, %vm822_vm10 }
 0x15a   : > { %v820_v34 = vmul.f32 %v2023_v2, %v819_v9  ;;  %v667_v17 = vpop.xlane.xlu0 %666  ;;  %v671_v28 = vpop.xlane.xlu1 %670  ;;  %v2118_v42 = vmul.f32 %v2076_v22, %v2076_v22  ;;  %v2122_v35 = vmul.f32 %v1761_v19, %v621_v20  ;;  %v983_v18 = vmul.f32 %v1833_v44, %v964_v21 }
 0x15b   : > { %1454 = vrsqrt.f32 %v2099_v58  ;;  %v864_v10 = vsel %vm2112_vm12, %v1972_v23, %v860_v15  ;;  %v726_v4 = vmul.f32 %v2107_v25, %v2107_v25  ;;  %v710_v33 = vmul.f32 %v1761_v19, %v667_v17 }
 0x15c   : > { %v669_v56 = vpop.xlane.xlu2 %668  ;;  %v824_v20 = vsel %vm2130_vm13, %v2023_v2, %v820_v34  ;;  %v728_v31 = vmul.f32 %v2097_v47, %v2097_v47  ;;  %v712_v23 = vmul.f32 %v1761_v19, %v671_v28  ;;  %v979_v13 = vmul.f32 %v1833_v44, %v960_v6 }
 0x15d   : > { %v711_v39 = vmul.f32 %v1761_v19, %v669_v56  ;;  %v898_v62 = vmul.f32 0.5, %v897_v14  ;;  %v776_v9 = vsub.f32 %v1731_v60, %v2097_v47  ;;  %v742_v36 = vsub.f32 %v710_v33, %v726_v4 }
 0x15e   : > { %v1453_v38 = vpop.eup %1452  ;;  %v2497_v40 = vsub.f32 %v1698_v43, %v1841_v49  ;;  %v727_v15 = vmul.f32 %v2122_v35, %v2122_v35  ;;  %v744_v34 = vsub.f32 %v712_v23, %v728_v31  ;;  %v2155_v17 = vsel %vm1052_vm7, %v1001_v32, 0.0 }
 0x15f   : > { %v826_v2 = vmul.f32 %v1453_v38, %v2081_v59  ;;  %vm1049_vm14 = vcmp.lt.s32.totalorder %v1977_v26, 500  ;;  %v2498_v37 = vsub.f32 %v1692_v41, %v1908_v5  ;;  %vm901_vm15 = vweird.f32 %v1990_v27 }
 0x160   : > { %v961_v21 = vmul.f32 %v864_v10, %v2497_v40  ;;  %v1018_v43 = vadd.s32 56, %v1823_v29  ;;  %v758_v49 = vmax.f32 %v742_v36, 0.0  ;;  %v2166_v28 = vadd.f32 %v1855_v12, %v983_v18 }
 0x161   : > { %v957_v6 = vmul.f32 %v824_v20, %v2498_v37  ;;  %v2163_v14 = vpop.eup %1454  ;;  %vm1046_vm0 = vcmp.lt.s32.totalorder %v2029_v30, 500  ;;  %v827_v52 = vmul.f32 %v1453_v38, %v826_v2  ;;  %v760_v56 = vmax.f32 %v744_v34, 0.0 }
 0x162   : > { %v743_v32 = vsub.f32 %v711_v39, %v727_v15  ;;  %v998_v16 = vadd.f32 %v1855_v12, %v979_v13  ;;  %v899_v10 = vsub.f32 1.5, %v898_v62  ;;  %vm902_vm1 = vweird.f32 %v2042_v24  ;;  %v673_v33 = vpop.xlane.xlu0 %672  ;;  %v675_v62 = vpop.xlane.xlu1 %674 }
 0x163   : > { %v866_v41 = vmul.f32 %v2163_v14, %v2099_v58  ;;  %vm1050_vm2 = vcmp.lt.s32.totalorder %v2003_v53, 500  ;;  %v980_v5 = vmul.f32 %v1833_v44, %v961_v21  ;;  %v828_v0 = vmul.f32 0.5, %v827_v52  ;;  %vm2204_vm8 = vmor %vm901_vm15, %vm902_vm1 }
 0x164   : > { %v2175_v18 = vadd.f32 1e-05, %v758_v49  ;;  %v2177_v4 = vadd.f32 1e-05, %v760_v56  ;;  %v976_v20 = vmul.f32 %v1833_v44, %v957_v6  ;;  %v2181_v31 = vadd.s32 %v1838_v48, %v1018_v43  ;;  %v627_v13 = vpop.xlane.xlu2 %626 }
 0x165   : > { %v867_v23 = vmul.f32 %v2163_v14, %v866_v41  ;;  %v759_v39 = vmax.f32 %v743_v32, 0.0  ;;  %vm1047_vm3 = vcmp.lt.s32.totalorder %v2079_v1, 500  ;;  %v829_v36 = vsub.f32 1.5, %v828_v0 }
 0x166   : > { %vm831_vm4 = vweird.f32 %v2081_v59  ;;  %vm832_vm5 = vweird.f32 %v1453_v38  ;;  %1456 = vrsqrt.f32 %v2175_v18  ;;  %v900_v40 = vmul.f32 %v2042_v24, %v899_v10 }
 0x167   : > { %v868_v21 = vmul.f32 0.5, %v867_v23  ;;  %1458 = vrsqrt.f32 %v2177_v4  ;;  %v2189_v2 = vadd.f32 1e-05, %v759_v39  ;;  %v830_v15 = vmul.f32 %v1453_v38, %v829_v36  ;;  %vm833_vm6 = vmor %vm831_vm4, %vm832_vm5 }
 0x168   : > { %v713_v34 = vmul.f32 %v1761_v19, %v673_v33  ;;  %v2193_v37 = vmul.f32 %v1761_v19, %v627_v13  ;;  %v714_v6 = vmul.f32 %v1761_v19, %v675_v62  ;;  %v995_v59 = vadd.f32 %v1855_v12, %v976_v20 }
 0x169   : > { %v869_v43 = vsub.f32 1.5, %v868_v21  ;;  %vm872_vm7 = vweird.f32 %v2163_v14  ;;  %1460 = vrsqrt.f32 %v2189_v2  ;;  %v999_v49 = vadd.f32 %v1855_v12, %v980_v5 }
 0x16a   : > { %v834_v56 = vsel %vm833_vm6, %v1453_v38, %v830_v15  ;;  %v745_v32 = vsub.f32 %v713_v34, %v2118_v42  ;;  %v730_v10 = vmul.f32 %v2193_v37, %v2193_v37  ;;  %v904_v41 = vsel %vm2204_vm8, %v2042_v24, %v900_v40 }
 0x16b   : > { %v958_v5 = vmul.f32 %v834_v56, %v766_v7  ;;  %v870_v27 = vmul.f32 %v2163_v14, %v869_v43  ;;  %vm871_vm9 = vweird.f32 %v2099_v58  ;;  %v1097_v38 = vsel %vm1049_vm14, %v998_v16, 0.0 }
 0x16c   : > { %v1457_v0 = vpop.eup %1456  ;;  %v774_v42 = vsub.f32 %v1738_v63, %v2107_v25  ;;  %vm873_vm10 = vmor %vm871_vm9, %vm872_vm7  ;;  %v761_v33 = vmax.f32 %v745_v32, 0.0  ;;  %v746_v20 = vsub.f32 %v714_v6, %v730_v10  ;;  %v1094_v55 = vsel %vm1046_vm0, %v995_v59, 0.0 }
 0x16d   : > { %v2223_v23 = vpop.eup %1458  ;;  %v977_v57 = vmul.f32 %v1833_v44, %v958_v5  ;;  %v874_v24 = vsel %vm873_vm10, %v2163_v14, %v870_v27  ;;  %v906_v7 = vmul.f32 %v1457_v0, %v2175_v18  ;;  %v2501_v26 = vsub.f32 %v1704_v45, %v1912_v61 }
 0x16e   : > { %vm1051_vm11 = vcmp.lt.s32.totalorder %v2181_v31, 500  ;;  %v2502_v63 = vsub.f32 %v1712_v50, %v1987_v54  ;;  %v926_v30 = vmul.f32 %v2223_v23, %v2177_v4  ;;  %v2239_v16 = vadd.f32 1e-05, %v761_v33 }
 0x16f   : > { %v965_v58 = vmul.f32 %v904_v41, %v2501_v26  ;;  %v1461_v39 = vpop.eup %1460  ;;  %v1098_v14 = vsel %vm1050_vm2, %v999_v49, 0.0  ;;  %v996_v13 = vadd.f32 %v1855_v12, %v977_v57  ;;  %v907_v62 = vmul.f32 %v1457_v0, %v906_v7 }
 0x170   : > { %v962_v25 = vmul.f32 %v874_v24, %v2502_v63  ;;  %v762_v45 = vmax.f32 %v746_v20, 0.0  ;;  %vm1053_vm12 = vcmp.lt.s32.totalorder %v1960_v11, 500  ;;  %v1110_v61 = vadd.f32 %v2038_v8, %v1094_v55 }
 0x171   : > { %v1022_v50 = vadd.s32 88, %v1823_v29  ;;  %v927_v54 = vmul.f32 %v2223_v23, %v926_v30  ;;  %v916_v36 = vmul.f32 %v1461_v39, %v2189_v2  ;;  %v1095_v40 = vsel %vm1047_vm3, %v996_v13, 0.0 }
 0x172   : > { %v981_v53 = vmul.f32 %v1833_v44, %v962_v25  ;;  %v908_v21 = vmul.f32 0.5, %v907_v62  ;;  %1462 = vrsqrt.f32 %v2239_v16  ;;  %v984_v15 = vmul.f32 %v1833_v44, %v965_v58 }
 0x173   : > { %v1111_v34 = vadd.f32 %v1110_v61, %v1095_v40  ;;  %v928_v6 = vmul.f32 0.5, %v927_v54  ;;  %v917_v59 = vmul.f32 %v1461_v39, %v916_v36  ;;  %vm1054_vm13 = vcmp.lt.s32.totalorder %v2058_v46, 500  ;;  %v2505_v54 = vld [vmem:[#allocation9_spill] sm:$0xff] }
 0x174   : > { %v909_v8 = vsub.f32 1.5, %v908_v21  ;;  %vm911_vm14 = vweird.f32 %v2175_v18  ;;  %vm912_vm15 = vweird.f32 %v1457_v0  ;;  %v2256_v43 = vadd.f32 1e-05, %v762_v45 }
 0x175   : > { %v1112_v1 = vadd.f32 %v1111_v34, %v2016_v51  ;;  %v929_v49 = vsub.f32 1.5, %v928_v6  ;;  %vm932_vm0 = vweird.f32 %v2223_v23  ;;  %v918_v52 = vmul.f32 0.5, %v917_v59  ;;  %vm913_vm2 = vmor %vm911_vm14, %vm912_vm15 }
 0x176   : > { %v1000_v56 = vadd.f32 %v1855_v12, %v981_v53  ;;  %v910_v32 = vmul.f32 %v1457_v0, %v909_v8  ;;  %vm931_vm1 = vweird.f32 %v2177_v4  ;;  %1464 = vrsqrt.f32 %v2256_v43 }
 0x177   : > { %v1113_v10 = vadd.f32 %v1112_v1, %v1097_v38  ;;  %v930_v18 = vmul.f32 %v2223_v23, %v929_v49  ;;  %v919_v41 = vsub.f32 1.5, %v918_v52  ;;  %vm922_vm3 = vweird.f32 %v1461_v39  ;;  %vm2265_vm4 = vmor %vm931_vm1, %vm932_vm0 }
 0x178   : > { %v1463_v5 = vpop.eup %1462  ;;  %v1039_v51 = vadd.s32 %v1838_v48, %v1022_v50  ;;  %v914_v27 = vsel %vm913_vm2, %v1457_v0, %v910_v32  ;;  %v1023_v20 = vadd.s32 96, %v1823_v29  ;;  %vm921_vm5 = vweird.f32 %v2189_v2  ;;  %v2506_v32 = vld [vmem:[#allocation10_spill] sm:$0xff] }
 0x179   : > { %v1114_v4 = vadd.f32 %v1113_v10, %v1098_v14  ;;  %v966_v55 = vmul.f32 %v914_v27, %v774_v42  ;;  %v934_v38 = vsel %vm2265_vm4, %v2223_v23, %v930_v18  ;;  %v920_v57 = vmul.f32 %v1461_v39, %v919_v41  ;;  %vm923_vm6 = vmor %vm921_vm5, %vm922_vm3 }
 0x17a   : > { %v1099_v24 = vsel %vm1051_vm11, %v1000_v56, 0.0  ;;  %v775_v0 = vsub.f32 %v1743_v3, %v2122_v35  ;;  %v1024_v7 = vadd.s32 104, %v1823_v29  ;;  %v936_v26 = vmul.f32 %v1463_v5, %v2239_v16 }
 0x17b   : > { %v1003_v2 = vadd.f32 %v1855_v12, %v984_v15  ;;  %v1115_v58 = vadd.f32 %v1114_v4, %v1099_v24  ;;  %v985_v42 = vmul.f32 %v1833_v44, %v966_v55  ;;  %v924_v63 = vsel %vm923_vm6, %v1461_v39, %v920_v57 }
 0x17c   : > { %v1465_v25 = vpop.eup %1464  ;;  %v1101_v31 = vsel %vm1053_vm12, %v2166_v28, 0.0  ;;  %v968_v3 = vmul.f32 %v934_v38, %v776_v9  ;;  %v967_v35 = vmul.f32 %v924_v63, %v775_v0  ;;  %v937_v23 = vmul.f32 %v1463_v5, %v936_v26 }
 0x17d   : > { %v1116_v30 = vadd.f32 %v1115_v58, %v2155_v17  ;;  %vm1055_vm7 = vcmp.lt.s32.totalorder %v1039_v51, 500  ;;  %v1040_v14 = vadd.s32 %v1838_v48, %v1023_v20  ;;  %v946_v13 = vmul.f32 %v1465_v25, %v2256_v43 }
 0x17e   : > { %v1004_v39 = vadd.f32 %v1855_v12, %v985_v42  ;;  %v1041_v62 = vadd.s32 %v1838_v48, %v1024_v7  ;;  %v986_v11 = vmul.f32 %v1833_v44, %v967_v35  ;;  %v938_v28 = vmul.f32 0.5, %v937_v23  ;;  %v1108_v7 = vld [vmem:[#allocation2] sm:$0x1] }
 0x17f   : > { %v1102_v60 = vsel %vm1054_vm13, %v1003_v2, 0.0  ;;  %v1117_v47 = vadd.f32 %v1116_v30, %v1101_v31  ;;  %v1025_v9 = vadd.s32 112, %v1823_v29  ;;  %v947_v45 = vmul.f32 %v1465_v25, %v946_v13 }
 0x180   : > { %v987_v17 = vmul.f32 %v1833_v44, %v968_v3  ;;  %v1005_v61 = vadd.f32 %v1855_v12, %v986_v11  ;;  %v939_v50 = vsub.f32 1.5, %v938_v28  ;;  %vm942_vm8 = vweird.f32 %v1463_v5 }
 0x181   : > { %v777_v36 = vsub.f32 %v2505_v54, %v2076_v22  ;;  %v1118_v40 = vadd.f32 %v1117_v47, %v1102_v60  ;;  %vm1056_vm9 = vcmp.lt.s32.totalorder %v1040_v14, 500  ;;  %v948_v53 = vmul.f32 0.5, %v947_v45 }
 0x182   : > { %v1103_v21 = vsel %vm1055_vm7, %v1004_v39, 0.0  ;;  %vm1057_vm10 = vcmp.lt.s32.totalorder %v1041_v62, 500  ;;  %v940_v46 = vmul.f32 %v1463_v5, %v939_v50  ;;  %vm941_vm11 = vweird.f32 %v2239_v16 }
 0x183   : > { %v1119_v15 = vadd.f32 %v1118_v40, %v1103_v21  ;;  %vm943_vm12 = vmor %vm941_vm11, %vm942_vm8  ;;  %v1026_v34 = vadd.s32 120, %v1823_v29  ;;  %v949_v6 = vsub.f32 1.5, %v948_v53  ;;  %vm952_vm13 = vweird.f32 %v1465_v25 }
 0x184   : > { %v1006_v59 = vadd.f32 %v1855_v12, %v987_v17  ;;  %v1104_v8 = vsel %vm1056_vm9, %v1005_v61, 0.0  ;;  %v1042_v22 = vadd.s32 %v1838_v48, %v1025_v9  ;;  %v944_v1 = vsel %vm943_vm12, %v1463_v5, %v940_v46 }
 0x185   : > { %v1120_v49 = vadd.f32 %v1119_v15, %v1104_v8  ;;  %v969_v52 = vmul.f32 %v944_v1, %v777_v36  ;;  %v950_v56 = vmul.f32 %v1465_v25, %v949_v6  ;;  %vm951_vm14 = vweird.f32 %v2256_v43 }
 0x186   : > { %v778_v16 = vsub.f32 %v2506_v32, %v2193_v37  ;;  %vm953_vm15 = vmor %vm951_vm14, %vm952_vm13  ;;  %v1043_v29 = vadd.s32 %v1838_v48, %v1026_v34  ;;  %v1105_v41 = vsel %vm1057_vm10, %v1006_v59, 0.0  ;;  %vm1058_vm0 = vcmp.lt.s32.totalorder %v1042_v22, 500 }
 0x187   : > { %v988_v10 = vmul.f32 %v1833_v44, %v969_v52  ;;  %v954_v18 = vsel %vm953_vm15, %v1465_v25, %v950_v56  ;;  %v1121_v27 = vadd.f32 %v1120_v49, %v1105_v41 }
 0x188   : > { %v970_v51 = vmul.f32 %v954_v18, %v778_v16  ;;  %vm1059_vm1 = vcmp.lt.s32.totalorder %v1043_v29, 500 }
 0x189   : > { %v1007_v5 = vadd.f32 %v1855_v12, %v988_v10 }
 0x18a   : > { %v989_v33 = vmul.f32 %v1833_v44, %v970_v51 }
 0x18b   : > { %v1106_v20 = vsel %vm1058_vm0, %v1007_v5, 0.0 }
 0x18c   : > { %v1008_v43 = vadd.f32 %v1855_v12, %v989_v33  ;;  %v1122_v37 = vadd.f32 %v1121_v27, %v1106_v20 }
 0x18e   : > { %v1107_v4 = vsel %vm1059_vm1, %v1008_v43, 0.0 }
 0x18f   : > { %v1123_v55 = vadd.f32 %v1122_v37, %v1107_v4 }
 0x191   : > { %v1124_v38 = vrot.slane %v1123_v55, 4 }
 0x193   : > { %v1125_v57 = vadd.f32 %v1124_v38, %v1123_v55 }
 0x195   : > { %v1126_v48 = vrot.slane %v1125_v57, 2 }
 0x197   : > { %v1127_v24 = vadd.f32 %v1126_v48, %v1125_v57 }
 0x199   : > { %v1128_v0 = vrot.slane %v1127_v24, 1 }
 0x19b   : > { %v1129_v26 = vadd.f32 %v1128_v0, %v1127_v24  ;;  %1135 = sbr.rel (%p1394_p5) target bundleno = 1077 (0x435), region = 80 }
 0x19d   : > { %v1130_v2 = vadd.f32 %v1129_v26, %v1108_v7 }
 0x19f   : > { %1131 = vst [vmem:[#allocation2] sm:$0x1] %v1130_v2 }
 0x1a0   : > { %v1139_v44 = vld [vmem:[%s2459_s4 + $0x8] sm:$0xff]  ;;  %v1138_v12 = vld [vmem:[%s2459_s4] sm:$0xff]  ;;  %vm1141_vm2 = vcmask 130048   ;;  %vm1165_vm3 = vcmask 1040384   ;;  %v1242_v23 = vld [vmem:[%s2463_s8 + $0x78] sm:$0xff] }
 0x1a1   : > { %1159 = vmatpush.msra.mxu0 %v1139_v44  ;;  %v1137_v58 = vld [vmem:[%s2456_s1] sm:$0x1]  ;;  %v1241_v30 = vld [vmem:[%s2463_s8 + $0x70] sm:$0xff]  ;;  %1279 = vmatpush.msra.mxu2 %v1242_v23  ;;  %v1240_v14 = vld [vmem:[%s2463_s8 + $0x68] sm:$0xff] }
 0x1a2   : > { %v1140_v42 = vld [vmem:[%s2460_s5] sm:$0x1]  ;;  %v1258_v13 = vld [vmem:[%s2464_s9 + $0x78] sm:$0xff]  ;;  %v1257_v62 = vld [vmem:[%s2464_s9 + $0x70] sm:$0xff] }
 0x1a3   : > { %1160 = vmatpush.msra.mxu0 %v1138_v12  ;;  %1280 = vmatpush.msra.mxu2 %v1241_v30  ;;  %v1239_v39 = vld [vmem:[%s2463_s8 + $0x60] sm:$0xff]  ;;  %v1238_v11 = vld [vmem:[%s2463_s8 + $0x58] sm:$0xff]  ;;  %v1256_v28 = vld [vmem:[%s2464_s9 + $0x68] sm:$0xff] }
 0x1a4   : > { %1395 = vmatmul.msk.f32.vlgmr.msra.gmra.mxu0 %vm1141_vm2, %v1137_v58  ;;  %1259 = vmatpush.msra.mxu1 %v1258_v13  ;;  %v1237_v60 = vld [vmem:[%s2463_s8 + $0x50] sm:$0xff]  ;;  %v1255_v47 = vld [vmem:[%s2464_s9 + $0x60] sm:$0xff]  ;;  %v1236_v9 = vld [vmem:[%s2463_s8 + $0x48] sm:$0xff] }
 0x1a5   : > { %1281 = vmatpush.msra.mxu2 %v1240_v14  ;;  %v1254_v45 = vld [vmem:[%s2464_s9 + $0x58] sm:$0xff]  ;;  %v1235_v17 = vld [vmem:[%s2463_s8 + $0x40] sm:$0xff]  ;;  %v1253_v61 = vld [vmem:[%s2464_s9 + $0x50] sm:$0xff] }
 0x1a6   : > { %1260 = vmatpush.msra.mxu1 %v1257_v62  ;;  %v1234_v50 = vld [vmem:[%s2463_s8 + $0x38] sm:$0xff]  ;;  %v1252_v54 = vld [vmem:[%s2464_s9 + $0x48] sm:$0xff]  ;;  %v1233_v36 = vld [vmem:[%s2463_s8 + $0x30] sm:$0xff] }
 0x1a7   : > { %1282 = vmatpush.msra.mxu2 %v1239_v39  ;;  %v1251_v40 = vld [vmem:[%s2464_s9 + $0x40] sm:$0xff]  ;;  %v1232_v53 = vld [vmem:[%s2463_s8 + $0x28] sm:$0xff]  ;;  %v1250_v21 = vld [vmem:[%s2464_s9 + $0x38] sm:$0xff] }
 0x1a8   : > { %1261 = vmatpush.msra.mxu1 %v1256_v28  ;;  %v1231_v46 = vld [vmem:[%s2463_s8 + $0x20] sm:$0xff]  ;;  %v1249_v15 = vld [vmem:[%s2464_s9 + $0x30] sm:$0xff]  ;;  %v1230_v34 = vld [vmem:[%s2463_s8 + $0x18] sm:$0xff] }
 0x1a9   : > { %1283 = vmatpush.msra.mxu2 %v1238_v11  ;;  %v1248_v6 = vld [vmem:[%s2464_s9 + $0x28] sm:$0xff]  ;;  %v1229_v59 = vld [vmem:[%s2463_s8 + $0x10] sm:$0xff]  ;;  %v1247_v8 = vld [vmem:[%s2464_s9 + $0x20] sm:$0xff]  ;;  %v1513_v11 = vmov 0  }
 0x1aa   : > { %1262 = vmatpush.msra.mxu1 %v1255_v47  ;;  %v1228_v22 = vld [vmem:[%s2463_s8 + $0x8] sm:$0xff]  ;;  %v1246_v1 = vld [vmem:[%s2464_s9 + $0x18] sm:$0xff]  ;;  %v1227_v49 = vld [vmem:[%s2463_s8] sm:$0xff]  ;;  %1466 = vset.pattern.permute.xlu0 %v1513_v11 }
 0x1ab   : > { %1284 = vmatpush.msra.mxu2 %v1237_v60  ;;  %v1136_v56 = vld [vmem:[#allocation2] sm:$0x1]  ;;  %v1245_v32 = vld [vmem:[%s2464_s9 + $0x10] sm:$0xff]  ;;  %v1244_v16 = vld [vmem:[%s2464_s9 + $0x8] sm:$0xff] }
 0x1ac   : > { %1263 = vmatpush.msra.mxu1 %v1254_v45  ;;  %v1243_v29 = vld [vmem:[%s2464_s9] sm:$0xff]  ;;  %v2508_v26 = vld [vmem:[#allocation8_spill] sm:$0xff]  ;;  %v1199_v39 = vmul.f32 %v1136_v56, %v1136_v56  ;;  %v1514_v45 = vmov 16384.0  }
 0x1ad   : > { %1285 = vmatpush.msra.mxu2 %v1236_v9  ;;  %v2507_v0 = vld [vmem:[#allocation7_spill] sm:$0xff]  ;;  %v1302_v23 = vld [vmem:[%s2466_s11] sm:$0x1]  ;;  %v1307_v28 = vld [vmem:[#allocation3] sm:$0x1] }
 0x1ae   : > { %1264 = vmatpush.msra.mxu1 %v1253_v61  ;;  %v1200_v62 = vsel %vm1165_vm3, %v1199_v39, 0.0 }
 0x1af   : > { %1286 = vmatpush.msra.mxu2 %v1235_v17 }
 0x1b0   : > { %1265 = vmatpush.msra.mxu1 %v1252_v54 }
 0x1b1   : > { %1287 = vmatpush.msra.mxu2 %v1234_v50 }
 0x1b2   : > { %1266 = vmatpush.msra.mxu1 %v1251_v40 }
 0x1b3   : > { %1288 = vmatpush.msra.mxu2 %v1233_v36 }
 0x1b4   : > { %1267 = vmatpush.msra.mxu1 %v1250_v21 }
 0x1b5   : > { %1289 = vmatpush.msra.mxu2 %v1232_v53 }
 0x1b6   : > { %1268 = vmatpush.msra.mxu1 %v1249_v15 }
 0x1b7   : > { %1290 = vmatpush.msra.mxu2 %v1231_v46 }
 0x1b8   : > { %1269 = vmatpush.msra.mxu1 %v1248_v6 }
 0x1b9   : > { %1291 = vmatpush.msra.mxu2 %v1230_v34 }
 0x1ba   : > { %1270 = vmatpush.msra.mxu1 %v1247_v8 }
 0x1bb   : > { %1292 = vmatpush.msra.mxu2 %v1229_v59 }
 0x1bc   : > { %1271 = vmatpush.msra.mxu1 %v1246_v1 }
 0x1bd   : > { %1293 = vmatpush.msra.mxu2 %v1228_v22 }
 0x1be   : > { %1272 = vmatpush.msra.mxu1 %v1245_v32 }
 0x1bf   : > { %1294 = vmatpush.msra.mxu2 %v1227_v49 }
 0x1c0   : > { %1295 = vmatmul.f32.vlgmr.msra.gmra.mxu2 %v1136_v56  ;;  %1273 = vmatpush.msra.mxu1 %v1244_v16 }
 0x1c2   : > { %1274 = vmatpush.msra.mxu1 %v1243_v29  ;;  %v2509_v29 = vlaneseq }
 0x221   : > { %v1162_v63 = vpop.f32.mrf.mxu0 }
 0x222   : > { %v2328_v25 = vadd.f32 %v1162_v63, %v1140_v42 }
 0x224   : > { %v1166_v31 = vsel %vm1165_vm3, %v2328_v25, 0.0  ;;  %v1169_v3 = vmul.f32 %v2328_v25, %v2328_v25 }
 0x225   : > { %1167 = vadd.xlane.f32.xlu0 %v1166_v31 }
 0x226   : > { %v1170_v35 = vsel %vm1165_vm3, %v1169_v3, 0.0 }
 0x22d   : > { %1171 = vadd.xlane.f32.xlu0 %v1170_v35 }
 0x243   : > { %v1296_v63 = vpop.f32.mrf.mxu2 }
 0x298   : > { %v1168_v52 = vpop.xlane.xlu0 %1167 }
 0x299   : > { %v1173_v10 = vmul.f32 %v1168_v52, %v1761_v19 }
 0x29b   : > { %v1175_v41 = vmul.f32 %v1173_v10, %v1173_v10  ;;  %v1178_v57 = vsub.f32 %v2328_v25, %v1173_v10  ;;  %v1299_v25 = vld [vmem:[%s2465_s10] sm:$0x1] }
 0x2a0   : > { %v1172_v18 = vpop.xlane.xlu0 %1171 }
 0x2a1   : > { %v1174_v51 = vmul.f32 %v1172_v18, %v1761_v19  ;;  %v1311_v18 = vand.u32 127, %v2509_v29 }
 0x2a3   : > { %v1176_v5 = vsub.f32 %v1174_v51, %v1175_v41  ;;  %vm1313_vm8 = vcmp.eq.s32.totalorder %v1311_v18, 1  ;;  %vm1312_vm9 = vcmp.eq.s32.totalorder %v1311_v18, 0 }
 0x2a5   : > { %v1177_v27 = vmax.f32 %v1176_v5, 0.0 }
 0x2a7   : > { %v1179_v33 = vadd.f32 1e-05, %v1177_v27 }
 0x2a9   : > { %1467 = vrsqrt.f32 %v1179_v33  ;;  %vm1186_vm5 = vweird.f32 %v1179_v33 }
 0x2aa   : > { %1469 = vrcp.f32 %v1514_v45 }
 0x2af   : > { %v1468_v20 = vpop.eup %1467 }
 0x2b0   : > { %v1181_v43 = vmul.f32 %v1468_v20, %v1179_v33  ;;  %vm1187_vm4 = vweird.f32 %v1468_v20  ;;  %v1470_v17 = vpop.eup %1469 }
 0x2b1   : > { %vm1188_vm6 = vmor %vm1186_vm5, %vm1187_vm4  ;;  %v1212_v61 = vmul.f32 16384.0, %v1470_v17  ;;  %vm1216_vm7 = vweird.f32 %v1470_v17 }
 0x2b2   : > { %v1182_v37 = vmul.f32 %v1468_v20, %v1181_v43 }
 0x2b3   : > { %v1213_v36 = vsub.f32 1.0, %v1212_v61 }
 0x2b4   : > { %v1183_v4 = vmul.f32 0.5, %v1182_v37 }
 0x2b5   : > { %v1214_v21 = vmul.f32 %v1470_v17, %v1213_v36 }
 0x2b6   : > { %v1184_v55 = vsub.f32 1.5, %v1183_v4 }
 0x2b7   : > { %v1215_v6 = vadd.f32 %v1470_v17, %v1214_v21 }
 0x2b8   : > { %v1185_v38 = vmul.f32 %v1468_v20, %v1184_v55 }
 0x2b9   : > { %v1217_v1 = vsel %vm1216_vm7, %v1470_v17, %v1215_v6 }
 0x2ba   : > { %v1189_v48 = vsel %vm1188_vm6, %v1468_v20, %v1185_v38 }
 0x2bb   : > { %v1190_v24 = vmul.f32 %v1189_v48, %v1178_v57 }
 0x2bd   : > { %v1191_v7 = vmul.f32 %v1190_v24, %v2507_v0 }
 0x2bf   : > { %v1192_v2 = vadd.f32 %v1191_v7, %v2508_v26 }
 0x2c1   : > { %1275 = vmatmul.f32.vlgmr.msra.gmra.mxu1 %v1192_v2  ;;  %v1203_v44 = vmul.f32 %v1192_v2, %v1192_v2  ;;  %v1193_v58 = vmul.f32 %v1192_v2, %v1136_v56 }
 0x2c3   : > { %v1204_v12 = vsel %vm1165_vm3, %v1203_v44, 0.0  ;;  %v1194_v42 = vsel %vm1165_vm3, %v1193_v58, 0.0 }
 0x2c4   : > { %1205 = vadd.xlane.f32.xlu2 %v1204_v12 }
 0x2cc   : > { %1195 = vadd.xlane.f32.xlu2 %v1194_v42 }
 0x337   : > { %v1206_v54 = vpop.xlane.xlu2 %1205 }
 0x338   : > { %v1219_v53 = vmul.f32 2.0, %v1206_v54  ;;  %v1221_v59 = vmul.f32 %v1206_v54, %v1206_v54 }
 0x33a   : > { %v1220_v34 = vsub.f32 128.0, %v1219_v53 }
 0x33c   : > { %v1222_v22 = vadd.f32 %v1221_v59, %v1220_v34 }
 0x33e   : > { %v1276_v31 = vpop.f32.mrf.mxu1  ;;  %v1223_v52 = vmul.f32 %v1222_v22, %v1217_v1 }
 0x33f   : > { %v1297_v3 = vadd.f32 %v1296_v63, %v1276_v31  ;;  %v1196_v56 = vpop.xlane.xlu2 %1195 }
 0x340   : > { %v1197_v16 = vsub.f32 0.0, %v1196_v56 }
 0x341   : > { %v1300_v35 = vadd.f32 %v1299_v25, %v1297_v3 }
 0x342   : > { %v1198_v41 = vmul.f32 %v1197_v16, %v1761_v19 }
 0x343   : > { %v1301_v30 = vmax.f32 %v1300_v35, 0.0 }
 0x345   : > { %v1303_v14 = vmul.f32 %v1302_v23, %v1301_v30 }
 0x347   : > { %v1304_v13 = vsel %vm1165_vm3, %v1303_v14, 0.0 }
 0x348   : > { %1305 = vadd.xlane.f32.xlu1 %v1304_v13 }
 0x350   : > { %1201 = vadd.xlane.f32.xlu1 %v1200_v62 }
 0x3bb   : > { %v1306_v60 = vpop.xlane.xlu1 %1305 }
 0x3bc   : > { %v1308_v47 = vadd.f32 %v1307_v28, %v1306_v60 }
 0x3be   : > { %v1309_v9 = vmax.f32 %v1308_v47, 0.0 }
 0x3c0   : > { %1317 = vperm.xlu0 %1466, %v1309_v9  }
 0x3c3   : > { %v1202_v50 = vpop.xlane.xlu1 %1201 }
 0x3c4   : > { %v1207_v40 = vmul.f32 2.0, %v1202_v50  ;;  %v1209_v15 = vmul.f32 %v1202_v50, %v1202_v50 }
 0x3c6   : > { %v1208_v46 = vsub.f32 128.0, %v1207_v40 }
 0x3c8   : > { %v1210_v8 = vadd.f32 %v1209_v15, %v1208_v46 }
 0x3ca   : > { %v1218_v49 = vmul.f32 %v1217_v1, %v1210_v8 }
 0x3cc   : > { %v1224_v32 = vadd.f32 %v1223_v52, %v1218_v49 }
 0x3ce   : > { %v1225_v10 = vmul.f32 0.1, %v1224_v32 }
 0x3d0   : > { %v1226_v51 = vadd.f32 %v1225_v10, %v1198_v41 }
 0x3d2   : > { %v1314_v27 = vsel %vm1313_vm8, %v1226_v51, 0.0 }
 0x432   : > { %v1318_v5 = vpop.permute.xlu0 %1317 }
 0x433   : > { %v1320_v33 = vsel %vm1312_vm9, %v1318_v5, %v1314_v27 }
 0x434   : > { %1321 = vst [vmem:[#allocation4] sm:$0x1] %v1320_v33 }
 0x435 PF: > { %p1416_p6 = scmp.eq.s32.totalorder %s1595_s28, 3  ;;  %s1515_s12 = smov [#allocation4]  }
 0x436   : > { %s1328_s29 = sshll.u32 %s1515_s12, 4  ;;  %s1330_s15 = sshll.u32 %s2468_s13, 4  ;;  %s1329_s29 = int_to_ptr.vmem [resolvable:$true] %s1328_s29  ;;  %s1331_s15 = int_to_ptr.hbm [resolvable:$true] %s1330_s15 }
 0x437   : > { %1413 = dma.vmem_to_hbm [thread:$0]  (%p1416_p6), %s1329_s29, 16, %s1331_s15, [#allocation5]  }
 0x438   : > { %1504 = dma.done.wait (%p1416_p6), [#allocation5], 16  }
 0x439   : > { %1506 = vsyncadd (%p1416_p6), [#allocation5], 4294967280 }
 0x43a PF: > { %s26_s27 = sadd.s32 1, %s1509_s27  }
 0x43b   : > { %p23_p7 = scmp.ge.s32.totalorder %s26_s27, 6  }
 0x43d   :  { %25 = sbr.rel (!%p23_p7) target bundleno = 4 (0x4), region = 107 }
 0x442   :  { %1344 = vsyncpa [#allocation5], 1 }
 0x443   :  { %1346 = vsyncpa [#allocation5 + $0x1], 1 }

</bundles_post_ra>
